<compile_context>
chip_gen: v5e
topology: v5e:2x2
jax: 0.10.0
libtpu: 0.0.40
codegen_flags: <defaults>
</compile_context>

<pallas_src>
import functools

import jax
import jax.numpy as jnp
from jax.experimental import pallas as pl
from jax.experimental.pallas import tpu as pltpu


def _round_up(x, m):
    return (x + m - 1) // m * m


def lstm_recurrent_kernel(gx_ref, whh_ref, y_ref, h_out_ref, c_out_ref,
                          h_scr, c_scr, *, hidden_pad, time_chunk, seq_len,
                          mask_tail):
    t_chunk = pl.program_id(1)

    # Zero-init the carries (matching set_hidden) at the start of each
    # batch-tile's time loop.
    @pl.when(t_chunk == 0)
    def _():
        h_scr[...] = jnp.zeros_like(h_scr)
        c_scr[...] = jnp.zeros_like(c_scr)

    Hp = hidden_pad
    whh = whh_ref[...]                      # (Hp, 4*Hp), bf16 (resident weight)

    def step(i, carry):
        h, c = carry                        # f32 (Bt, Hp)
        # gates = Gx[t] + h @ W_hh^T ; MXU matmul in bf16, accumulate f32.
        gates = gx_ref[i] + jnp.dot(h.astype(whh.dtype), whh,
                                    preferred_element_type=jnp.float32)
        # 128-aligned, lane-dense gate slabs (i, f, g, o) — pure VPU/EUP math.
        i_g = jax.nn.sigmoid(gates[:, 0 * Hp:1 * Hp])
        f_g = jax.nn.sigmoid(gates[:, 1 * Hp:2 * Hp])
        g_g = jnp.tanh(gates[:, 2 * Hp:3 * Hp])
        o_g = jax.nn.sigmoid(gates[:, 3 * Hp:4 * Hp])
        cy = f_g * c + i_g * g_g
        hy = o_g * jnp.tanh(cy)
        if mask_tail:
            # Padded tail time steps must not advance the recurrence.
            valid = (t_chunk * time_chunk + i) < seq_len
            hy = jnp.where(valid, hy, h)
            cy = jnp.where(valid, cy, c)
        y_ref[i] = hy.astype(y_ref.dtype)
        return hy, cy

    h_fin, c_fin = jax.lax.fori_loop(
        0, time_chunk, step, (h_scr[...], c_scr[...]), unroll=True)
    h_scr[...] = h_fin
    c_scr[...] = c_fin

    # Final-state write only on the last time chunk (saves per-step stores).
    @pl.when(t_chunk == pl.num_programs(1) - 1)
    def _():
        h_out_ref[...] = h_fin.astype(h_out_ref.dtype)
        c_out_ref[...] = c_fin.astype(c_out_ref.dtype)


def lstm_layer(x, w_ih, w_hh, hidden_size, *,
               time_chunk=16, batch_tile=None,
               matmul_dtype=jnp.bfloat16):
    """One LSTM layer over a (T, B, in_features) input.

    w_ih: (4H, in_features)   (PyTorch Linear weight layout, gate order i,f,g,o)
    w_hh: (4H, H)
    Returns (y, (h_T, c_T)) with y: (T, B, H).
    """
    T, B, I = x.shape
    H = hidden_size

    Hp = _round_up(H, 128)                       # lane-dense gate slabs
    Bt = _round_up(B, 8) if batch_tile is None else _round_up(batch_tile, 8)
    Bp = _round_up(B, Bt)
    Tc = min(time_chunk, T)
    Tp = _round_up(T, Tc)
    n_b = Bp // Bt
    n_t = Tp // Tc
    mask_tail = (Tp != T)

    # ---- Pad weights per-gate so each gate occupies a 128-aligned lane range.
    w_ih_g = jnp.pad(w_ih.reshape(4, H, I), ((0, 0), (0, Hp - H), (0, 0)))
    w_ih_t = jnp.transpose(w_ih_g.reshape(4 * Hp, I))          # (I, 4*Hp) f32
    w_hh_g = jnp.pad(w_hh.reshape(4, H, H),
                     ((0, 0), (0, Hp - H), (0, Hp - H)))
    w_hh_t = jnp.transpose(w_hh_g.reshape(4 * Hp, Hp))         # (Hp, 4*Hp)
    w_hh_t = w_hh_t.astype(matmul_dtype)

    # ---- Hoisted input projection: one big MXU-friendly matmul (plain XLA).
    gx = jnp.dot(x.reshape(T * B, I), w_ih_t,
                 preferred_element_type=jnp.float32).reshape(T, B, 4 * Hp)
    gx = jnp.pad(gx, ((0, Tp - T), (0, Bp - B), (0, 0)))       # (Tp, Bp, 4*Hp)

    kernel = functools.partial(
        lstm_recurrent_kernel,
        hidden_pad=Hp, time_chunk=Tc, seq_len=T, mask_tail=mask_tail)

    # TODO(synk): for very large H on v7x (64 MiB VMEM), additionally set
    # pipeline_mode=pl.Buffered(1) on the constant-index weight BlockSpec and
    # raise vmem_limit_bytes; unnecessary at these sizes.
    y_pad, h_pad, c_pad = pl.pallas_call(
        kernel,
        out_shape=(
            jax.ShapeDtypeStruct((Tp, Bp, Hp), jnp.float32),
            jax.ShapeDtypeStruct((Bp, Hp), jnp.float32),
            jax.ShapeDtypeStruct((Bp, Hp), jnp.float32),
        ),
        grid_spec=pltpu.PrefetchScalarGridSpec(
            num_scalar_prefetch=0,
            grid=(n_b, n_t),
            in_specs=[
                pl.BlockSpec((Tc, Bt, 4 * Hp), lambda b, t: (t, b, 0)),  # Gx
                pl.BlockSpec((Hp, 4 * Hp), lambda b, t: (0, 0)),         # W_hh^T
            ],
            out_specs=[
                pl.BlockSpec((Tc, Bt, Hp), lambda b, t: (t, b, 0)),      # y
                pl.BlockSpec((Bt, Hp), lambda b, t: (b, 0)),             # h_T
                pl.BlockSpec((Bt, Hp), lambda b, t: (b, 0)),             # c_T
            ],
            scratch_shapes=[
                pltpu.VMEM((Bt, Hp), jnp.float32),   # h carry
                pltpu.VMEM((Bt, Hp), jnp.float32),   # c carry
            ],
        ),
        compiler_params=pltpu.CompilerParams(
            dimension_semantics=("parallel", "arbitrary")),  # batch || , time seq
    )(gx, w_hh_t)

    y = y_pad[:T, :B, :H]
    h_T = h_pad[:B, :H]
    c_T = c_pad[:B, :H]
    return y, (h_T, c_T)


def init_lstm_params(key, input_size, hidden_size, num_layers):
    """uniform(-sqrt(1/H), sqrt(1/H)) init, matching LSTMCell.reset_params."""
    bound = (1.0 / hidden_size) ** 0.5
    params = []
    for i in range(num_layers):
        in_feat = input_size if i == 0 else hidden_size
        key, k1, k2 = jax.random.split(key, 3)
        w_ih = jax.random.uniform(k1, (4 * hidden_size, in_feat),
                                  minval=-bound, maxval=bound, dtype=jnp.float32)
        w_hh = jax.random.uniform(k2, (4 * hidden_size, hidden_size),
                                  minval=-bound, maxval=bound, dtype=jnp.float32)
        params.append((w_ih, w_hh))
    return params


def lstm_forward(x, params, hidden_size):
    """Full multi-layer LSTM forward (padded-tensor path; inference, so the
    inter-layer dropout branch is skipped as in the PyTorch code)."""
    layer_input = x
    final_hy, final_cy = [], []
    for (w_ih, w_hh) in params:
        layer_input, (h_T, c_T) = lstm_layer(layer_input, w_ih, w_hh, hidden_size)
        final_hy.append(h_T)
        final_cy.append(c_T)
    return layer_input, (jnp.stack(final_hy, 0), jnp.stack(final_cy, 0))


def lstm_reference(x, params, hidden_size):
    """Pure-JAX f32 reference for correctness checking (PyTorch semantics)."""
    T, B, _ = x.shape
    layer_input = x
    hys, cys = [], []
    for (w_ih, w_hh) in params:
        h = jnp.zeros((B, hidden_size), jnp.float32)
        c = jnp.zeros((B, hidden_size), jnp.float32)
        outs = []
        for t in range(T):
            gates = layer_input[t] @ w_ih.T + h @ w_hh.T
            i_g = jax.nn.sigmoid(gates[:, :hidden_size])
            f_g = jax.nn.sigmoid(gates[:, hidden_size:2 * hidden_size])
            g_g = jnp.tanh(gates[:, 2 * hidden_size:3 * hidden_size])
            o_g = jax.nn.sigmoid(gates[:, 3 * hidden_size:])
            c = f_g * c + i_g * g_g
            h = o_g * jnp.tanh(c)
            outs.append(h)
        layer_input = jnp.stack(outs, 0)
        hys.append(h)
        cys.append(c)
    return layer_input, (jnp.stack(hys, 0), jnp.stack(cys, 0))


if __name__ == "__main__":
    # Small, deterministic example consistent with the module's forward:
    # inputs (seq_len, batch, input_size).
    seq_len, batch, input_size, hidden_size, num_layers = 8, 2, 16, 32, 2

    key = jax.random.PRNGKey(0)
    key, xkey, pkey = jax.random.split(key, 3)
    x = jax.random.normal(xkey, (seq_len, batch, input_size), dtype=jnp.float32)
    params = init_lstm_params(pkey, input_size, hidden_size, num_layers)

    y, (h_n, c_n) = lstm_forward(x, params, hidden_size)
    y = jax.block_until_ready(y)
    h_n = jax.block_until_ready(h_n)
    c_n = jax.block_until_ready(c_n)

    # Sanity check against pure-JAX f32 reference. Tolerance is loosened
    # because the recurrent matmul runs with bf16 operands (f32 accumulate).
    y_ref, (h_ref, c_ref) = lstm_reference(x, params, hidden_size)
    assert y.shape == (seq_len, batch, hidden_size)
    assert h_n.shape == (num_layers, batch, hidden_size)
    assert c_n.shape == (num_layers, batch, hidden_size)
    assert jnp.allclose(y, y_ref, atol=5e-2, rtol=5e-2)
    assert jnp.allclose(h_n, h_ref, atol=5e-2, rtol=5e-2)
    assert jnp.allclose(c_n, c_ref, atol=5e-2, rtol=5e-2)

    # TODO(synk): packed-sequence (PackedSequence) path and training-mode
    # inter-layer dropout are not implemented (inference padded path only).
    print("KERNEL_OK")
</pallas_src>

<mosaic_0001>
module attributes {stable_mosaic.version = 11 : i64} {
  func.func @lstm_recurrent_kernel(%arg0: i32, %arg1: i32, %arg2: memref<8x8x512xf32, #tpu.memory_space<vmem>>, %arg3: memref<128x512xbf16, #tpu.memory_space<vmem>>, %arg4: memref<8x8x128xf32, #tpu.memory_space<vmem>>, %arg5: memref<8x128xf32, #tpu.memory_space<vmem>>, %arg6: memref<8x128xf32, #tpu.memory_space<vmem>>, %arg7: memref<8x128xf32, #tpu.memory_space<vmem>>, %arg8: memref<8x128xf32, #tpu.memory_space<vmem>>) attributes {dimension_semantics = [#tpu.dimension_semantics<parallel>, #tpu.dimension_semantics<arbitrary>], iteration_bounds = array<i64: 1, 1>, scalar_prefetch = 0 : i64, scratch_operands = 2 : i64, tpu.core_type = #tpu.core_type<tc>, window_params = [{transform_indices = @transform_0, window_bounds = array<i64: 8, 8, 512>}, {pipeline_mode = #tpu.pipeline_mode<synchronous>, transform_indices = @transform_1, window_bounds = array<i64: 128, 512>}, {transform_indices = @transform_2, window_bounds = array<i64: 8, 8, 128>}, {transform_indices = @transform_3, window_bounds = array<i64: 8, 128>}, {transform_indices = @transform_4, window_bounds = array<i64: 8, 128>}]} {
    %c0_i32 = arith.constant 0 : i32
    %0 = arith.cmpi eq, %arg1, %c0_i32 : i32
    %1 = arith.extui %0 : i1 to i32
    %c0_i32_0 = arith.constant 0 : i32
    %2 = arith.cmpi ne, %1, %c0_i32_0 : i32
    scf.if %2 {
      %cst_76 = arith.constant 0.000000e+00 : f32
      %291 = vector.broadcast %cst_76 : f32 to vector<8x128xf32>
      %c0_77 = arith.constant 0 : index
      %c0_78 = arith.constant 0 : index
      %292 = vector.load %arg7[%c0_77, %c0_78] : memref<8x128xf32, #tpu.memory_space<vmem>>, vector<8x128xf32>
      tpu.vector_store %arg7[%c0_77, %c0_78], %291 {strides = array<i32>} : memref<8x128xf32, #tpu.memory_space<vmem>>, vector<8x128xf32>,
      %cst_79 = arith.constant 0.000000e+00 : f32
      %293 = vector.broadcast %cst_79 : f32 to vector<8x128xf32>
      %c0_80 = arith.constant 0 : index
      %c0_81 = arith.constant 0 : index
      %294 = vector.load %arg8[%c0_80, %c0_81] : memref<8x128xf32, #tpu.memory_space<vmem>>, vector<8x128xf32>
      tpu.vector_store %arg8[%c0_80, %c0_81], %293 {strides = array<i32>} : memref<8x128xf32, #tpu.memory_space<vmem>>, vector<8x128xf32>,
    } else {
    }
    %c0 = arith.constant 0 : index
    %c0_1 = arith.constant 0 : index
    %3 = vector.load %arg3[%c0, %c0_1] : memref<128x512xbf16, #tpu.memory_space<vmem>>, vector<128x512xbf16>
    %c0_2 = arith.constant 0 : index
    %c0_3 = arith.constant 0 : index
    %4 = vector.load %arg7[%c0_2, %c0_3] : memref<8x128xf32, #tpu.memory_space<vmem>>, vector<8x128xf32>
    %c0_4 = arith.constant 0 : index
    %c0_5 = arith.constant 0 : index
    %5 = vector.load %arg8[%c0_4, %c0_5] : memref<8x128xf32, #tpu.memory_space<vmem>>, vector<8x128xf32>
    %c0_i32_6 = arith.constant 0 : i32
    %6 = arith.index_cast %c0_i32_6 : i32 to index
    %c0_7 = arith.constant 0 : index
    %c0_8 = arith.constant 0 : index
    %7 = vector.load %arg2[%6, %c0_7, %c0_8] : memref<8x8x512xf32, #tpu.memory_space<vmem>>, vector<1x8x512xf32>
    %8 = vector.shape_cast %7 : vector<1x8x512xf32> to vector<8x512xf32>
    %9 = arith.truncf %4 : vector<8x128xf32> to vector<8x128xbf16>
    %cst = arith.constant dense<0.000000e+00> : vector<8x512xf32>
    %10 = tpu.matmul %9, %3, %cst {dimension_numbers = #tpu.dot_dimension_numbers<[1], [0], [0], [1], [0, 0, 1, 1], [], []>} : vector<8x128xbf16>, vector<128x512xbf16>, vector<8x512xf32> -> vector<8x512xf32>
    %11 = arith.addf %8, %10 : vector<8x512xf32>
    %12 = vector.extract_strided_slice %11 {offsets = [0, 0], sizes = [8, 128], strides = [1, 1]} : vector<8x512xf32> to vector<8x128xf32>
    %13 = arith.negf %12 : vector<8x128xf32>
    %14 = math.exp %13 : vector<8x128xf32>
    %cst_9 = arith.constant 1.000000e+00 : f32
    %15 = vector.broadcast %cst_9 : f32 to vector<8x128xf32>
    %16 = arith.addf %15, %14 : vector<8x128xf32>
    %17 = arith.divf %15, %16 : vector<8x128xf32>
    %18 = vector.extract_strided_slice %11 {offsets = [0, 128], sizes = [8, 128], strides = [1, 1]} : vector<8x512xf32> to vector<8x128xf32>
    %19 = arith.negf %18 : vector<8x128xf32>
    %20 = math.exp %19 : vector<8x128xf32>
    %cst_10 = arith.constant 1.000000e+00 : f32
    %21 = vector.broadcast %cst_10 : f32 to vector<8x128xf32>
    %22 = arith.addf %21, %20 : vector<8x128xf32>
    %23 = arith.divf %21, %22 : vector<8x128xf32>
    %24 = vector.extract_strided_slice %11 {offsets = [0, 256], sizes = [8, 128], strides = [1, 1]} : vector<8x512xf32> to vector<8x128xf32>
    %25 = math.tanh %24 : vector<8x128xf32>
    %26 = vector.extract_strided_slice %11 {offsets = [0, 384], sizes = [8, 128], strides = [1, 1]} : vector<8x512xf32> to vector<8x128xf32>
    %27 = arith.negf %26 : vector<8x128xf32>
    %28 = math.exp %27 : vector<8x128xf32>
    %cst_11 = arith.constant 1.000000e+00 : f32
    %29 = vector.broadcast %cst_11 : f32 to vector<8x128xf32>
    %30 = arith.addf %29, %28 : vector<8x128xf32>
    %31 = arith.divf %29, %30 : vector<8x128xf32>
    %32 = arith.mulf %23, %5 : vector<8x128xf32>
    %33 = arith.mulf %17, %25 : vector<8x128xf32>
    %34 = arith.addf %32, %33 : vector<8x128xf32>
    %35 = math.tanh %34 : vector<8x128xf32>
    %36 = arith.mulf %31, %35 : vector<8x128xf32>
    %37 = arith.index_cast %c0_i32_6 : i32 to index
    %c0_12 = arith.constant 0 : index
    %c0_13 = arith.constant 0 : index
    %38 = vector.load %arg4[%37, %c0_12, %c0_13] : memref<8x8x128xf32, #tpu.memory_space<vmem>>, vector<1x8x128xf32>
    %39 = vector.shape_cast %38 : vector<1x8x128xf32> to vector<8x128xf32>
    %40 = vector.shape_cast %36 : vector<8x128xf32> to vector<1x8x128xf32>
    tpu.vector_store %arg4[%37, %c0_12, %c0_13], %40 {strides = array<i32>} : memref<8x8x128xf32, #tpu.memory_space<vmem>>, vector<1x8x128xf32>,
    %c1_i32 = arith.constant 1 : i32
    %41 = arith.index_cast %c1_i32 : i32 to index
    %c0_14 = arith.constant 0 : index
    %c0_15 = arith.constant 0 : index
    %42 = vector.load %arg2[%41, %c0_14, %c0_15] : memref<8x8x512xf32, #tpu.memory_space<vmem>>, vector<1x8x512xf32>
    %43 = vector.shape_cast %42 : vector<1x8x512xf32> to vector<8x512xf32>
    %44 = arith.truncf %36 : vector<8x128xf32> to vector<8x128xbf16>
    %cst_16 = arith.constant dense<0.000000e+00> : vector<8x512xf32>
    %45 = tpu.matmul %44, %3, %cst_16 {dimension_numbers = #tpu.dot_dimension_numbers<[1], [0], [0], [1], [0, 0, 1, 1], [], []>} : vector<8x128xbf16>, vector<128x512xbf16>, vector<8x512xf32> -> vector<8x512xf32>
    %46 = arith.addf %43, %45 : vector<8x512xf32>
    %47 = vector.extract_strided_slice %46 {offsets = [0, 0], sizes = [8, 128], strides = [1, 1]} : vector<8x512xf32> to vector<8x128xf32>
    %48 = arith.negf %47 : vector<8x128xf32>
    %49 = math.exp %48 : vector<8x128xf32>
    %cst_17 = arith.constant 1.000000e+00 : f32
    %50 = vector.broadcast %cst_17 : f32 to vector<8x128xf32>
    %51 = arith.addf %50, %49 : vector<8x128xf32>
    %52 = arith.divf %50, %51 : vector<8x128xf32>
    %53 = vector.extract_strided_slice %46 {offsets = [0, 128], sizes = [8, 128], strides = [1, 1]} : vector<8x512xf32> to vector<8x128xf32>
    %54 = arith.negf %53 : vector<8x128xf32>
    %55 = math.exp %54 : vector<8x128xf32>
    %cst_18 = arith.constant 1.000000e+00 : f32
    %56 = vector.broadcast %cst_18 : f32 to vector<8x128xf32>
    %57 = arith.addf %56, %55 : vector<8x128xf32>
    %58 = arith.divf %56, %57 : vector<8x128xf32>
    %59 = vector.extract_strided_slice %46 {offsets = [0, 256], sizes = [8, 128], strides = [1, 1]} : vector<8x512xf32> to vector<8x128xf32>
    %60 = math.tanh %59 : vector<8x128xf32>
    %61 = vector.extract_strided_slice %46 {offsets = [0, 384], sizes = [8, 128], strides = [1, 1]} : vector<8x512xf32> to vector<8x128xf32>
    %62 = arith.negf %61 : vector<8x128xf32>
    %63 = math.exp %62 : vector<8x128xf32>
    %cst_19 = arith.constant 1.000000e+00 : f32
    %64 = vector.broadcast %cst_19 : f32 to vector<8x128xf32>
    %65 = arith.addf %64, %63 : vector<8x128xf32>
    %66 = arith.divf %64, %65 : vector<8x128xf32>
    %67 = arith.mulf %58, %34 : vector<8x128xf32>
    %68 = arith.mulf %52, %60 : vector<8x128xf32>
    %69 = arith.addf %67, %68 : vector<8x128xf32>
    %70 = math.tanh %69 : vector<8x128xf32>
    %71 = arith.mulf %66, %70 : vector<8x128xf32>
    %72 = arith.index_cast %c1_i32 : i32 to index
    %c0_20 = arith.constant 0 : index
    %c0_21 = arith.constant 0 : index
    %73 = vector.load %arg4[%72, %c0_20, %c0_21] : memref<8x8x128xf32, #tpu.memory_space<vmem>>, vector<1x8x128xf32>
    %74 = vector.shape_cast %73 : vector<1x8x128xf32> to vector<8x128xf32>
    %75 = vector.shape_cast %71 : vector<8x128xf32> to vector<1x8x128xf32>
    tpu.vector_store %arg4[%72, %c0_20, %c0_21], %75 {strides = array<i32>} : memref<8x8x128xf32, #tpu.memory_space<vmem>>, vector<1x8x128xf32>,
    %c2_i32 = arith.constant 2 : i32
    %76 = arith.index_cast %c2_i32 : i32 to index
    %c0_22 = arith.constant 0 : index
    %c0_23 = arith.constant 0 : index
    %77 = vector.load %arg2[%76, %c0_22, %c0_23] : memref<8x8x512xf32, #tpu.memory_space<vmem>>, vector<1x8x512xf32>
    %78 = vector.shape_cast %77 : vector<1x8x512xf32> to vector<8x512xf32>
    %79 = arith.truncf %71 : vector<8x128xf32> to vector<8x128xbf16>
    %cst_24 = arith.constant dense<0.000000e+00> : vector<8x512xf32>
    %80 = tpu.matmul %79, %3, %cst_24 {dimension_numbers = #tpu.dot_dimension_numbers<[1], [0], [0], [1], [0, 0, 1, 1], [], []>} : vector<8x128xbf16>, vector<128x512xbf16>, vector<8x512xf32> -> vector<8x512xf32>
    %81 = arith.addf %78, %80 : vector<8x512xf32>
    %82 = vector.extract_strided_slice %81 {offsets = [0, 0], sizes = [8, 128], strides = [1, 1]} : vector<8x512xf32> to vector<8x128xf32>
    %83 = arith.negf %82 : vector<8x128xf32>
    %84 = math.exp %83 : vector<8x128xf32>
    %cst_25 = arith.constant 1.000000e+00 : f32
    %85 = vector.broadcast %cst_25 : f32 to vector<8x128xf32>
    %86 = arith.addf %85, %84 : vector<8x128xf32>
    %87 = arith.divf %85, %86 : vector<8x128xf32>
    %88 = vector.extract_strided_slice %81 {offsets = [0, 128], sizes = [8, 128], strides = [1, 1]} : vector<8x512xf32> to vector<8x128xf32>
    %89 = arith.negf %88 : vector<8x128xf32>
    %90 = math.exp %89 : vector<8x128xf32>
    %cst_26 = arith.constant 1.000000e+00 : f32
    %91 = vector.broadcast %cst_26 : f32 to vector<8x128xf32>
    %92 = arith.addf %91, %90 : vector<8x128xf32>
    %93 = arith.divf %91, %92 : vector<8x128xf32>
    %94 = vector.extract_strided_slice %81 {offsets = [0, 256], sizes = [8, 128], strides = [1, 1]} : vector<8x512xf32> to vector<8x128xf32>
    %95 = math.tanh %94 : vector<8x128xf32>
    %96 = vector.extract_strided_slice %81 {offsets = [0, 384], sizes = [8, 128], strides = [1, 1]} : vector<8x512xf32> to vector<8x128xf32>
    %97 = arith.negf %96 : vector<8x128xf32>
    %98 = math.exp %97 : vector<8x128xf32>
    %cst_27 = arith.constant 1.000000e+00 : f32
    %99 = vector.broadcast %cst_27 : f32 to vector<8x128xf32>
    %100 = arith.addf %99, %98 : vector<8x128xf32>
    %101 = arith.divf %99, %100 : vector<8x128xf32>
    %102 = arith.mulf %93, %69 : vector<8x128xf32>
    %103 = arith.mulf %87, %95 : vector<8x128xf32>
    %104 = arith.addf %102, %103 : vector<8x128xf32>
    %105 = math.tanh %104 : vector<8x128xf32>
    %106 = arith.mulf %101, %105 : vector<8x128xf32>
    %107 = arith.index_cast %c2_i32 : i32 to index
    %c0_28 = arith.constant 0 : index
    %c0_29 = arith.constant 0 : index
    %108 = vector.load %arg4[%107, %c0_28, %c0_29] : memref<8x8x128xf32, #tpu.memory_space<vmem>>, vector<1x8x128xf32>
    %109 = vector.shape_cast %108 : vector<1x8x128xf32> to vector<8x128xf32>
    %110 = vector.shape_cast %106 : vector<8x128xf32> to vector<1x8x128xf32>
    tpu.vector_store %arg4[%107, %c0_28, %c0_29], %110 {strides = array<i32>} : memref<8x8x128xf32, #tpu.memory_space<vmem>>, vector<1x8x128xf32>,
    %c3_i32 = arith.constant 3 : i32
    %111 = arith.index_cast %c3_i32 : i32 to index
    %c0_30 = arith.constant 0 : index
    %c0_31 = arith.constant 0 : index
    %112 = vector.load %arg2[%111, %c0_30, %c0_31] : memref<8x8x512xf32, #tpu.memory_space<vmem>>, vector<1x8x512xf32>
    %113 = vector.shape_cast %112 : vector<1x8x512xf32> to vector<8x512xf32>
    %114 = arith.truncf %106 : vector<8x128xf32> to vector<8x128xbf16>
    %cst_32 = arith.constant dense<0.000000e+00> : vector<8x512xf32>
    %115 = tpu.matmul %114, %3, %cst_32 {dimension_numbers = #tpu.dot_dimension_numbers<[1], [0], [0], [1], [0, 0, 1, 1], [], []>} : vector<8x128xbf16>, vector<128x512xbf16>, vector<8x512xf32> -> vector<8x512xf32>
    %116 = arith.addf %113, %115 : vector<8x512xf32>
    %117 = vector.extract_strided_slice %116 {offsets = [0, 0], sizes = [8, 128], strides = [1, 1]} : vector<8x512xf32> to vector<8x128xf32>
    %118 = arith.negf %117 : vector<8x128xf32>
    %119 = math.exp %118 : vector<8x128xf32>
    %cst_33 = arith.constant 1.000000e+00 : f32
    %120 = vector.broadcast %cst_33 : f32 to vector<8x128xf32>
    %121 = arith.addf %120, %119 : vector<8x128xf32>
    %122 = arith.divf %120, %121 : vector<8x128xf32>
    %123 = vector.extract_strided_slice %116 {offsets = [0, 128], sizes = [8, 128], strides = [1, 1]} : vector<8x512xf32> to vector<8x128xf32>
    %124 = arith.negf %123 : vector<8x128xf32>
    %125 = math.exp %124 : vector<8x128xf32>
    %cst_34 = arith.constant 1.000000e+00 : f32
    %126 = vector.broadcast %cst_34 : f32 to vector<8x128xf32>
    %127 = arith.addf %126, %125 : vector<8x128xf32>
    %128 = arith.divf %126, %127 : vector<8x128xf32>
    %129 = vector.extract_strided_slice %116 {offsets = [0, 256], sizes = [8, 128], strides = [1, 1]} : vector<8x512xf32> to vector<8x128xf32>
    %130 = math.tanh %129 : vector<8x128xf32>
    %131 = vector.extract_strided_slice %116 {offsets = [0, 384], sizes = [8, 128], strides = [1, 1]} : vector<8x512xf32> to vector<8x128xf32>
    %132 = arith.negf %131 : vector<8x128xf32>
    %133 = math.exp %132 : vector<8x128xf32>
    %cst_35 = arith.constant 1.000000e+00 : f32
    %134 = vector.broadcast %cst_35 : f32 to vector<8x128xf32>
    %135 = arith.addf %134, %133 : vector<8x128xf32>
    %136 = arith.divf %134, %135 : vector<8x128xf32>
    %137 = arith.mulf %128, %104 : vector<8x128xf32>
    %138 = arith.mulf %122, %130 : vector<8x128xf32>
    %139 = arith.addf %137, %138 : vector<8x128xf32>
    %140 = math.tanh %139 : vector<8x128xf32>
    %141 = arith.mulf %136, %140 : vector<8x128xf32>
    %142 = arith.index_cast %c3_i32 : i32 to index
    %c0_36 = arith.constant 0 : index
    %c0_37 = arith.constant 0 : index
    %143 = vector.load %arg4[%142, %c0_36, %c0_37] : memref<8x8x128xf32, #tpu.memory_space<vmem>>, vector<1x8x128xf32>
    %144 = vector.shape_cast %143 : vector<1x8x128xf32> to vector<8x128xf32>
    %145 = vector.shape_cast %141 : vector<8x128xf32> to vector<1x8x128xf32>
    tpu.vector_store %arg4[%142, %c0_36, %c0_37], %145 {strides = array<i32>} : memref<8x8x128xf32, #tpu.memory_space<vmem>>, vector<1x8x128xf32>,
    %c4_i32 = arith.constant 4 : i32
    %146 = arith.index_cast %c4_i32 : i32 to index
    %c0_38 = arith.constant 0 : index
    %c0_39 = arith.constant 0 : index
    %147 = vector.load %arg2[%146, %c0_38, %c0_39] : memref<8x8x512xf32, #tpu.memory_space<vmem>>, vector<1x8x512xf32>
    %148 = vector.shape_cast %147 : vector<1x8x512xf32> to vector<8x512xf32>
    %149 = arith.truncf %141 : vector<8x128xf32> to vector<8x128xbf16>
    %cst_40 = arith.constant dense<0.000000e+00> : vector<8x512xf32>
    %150 = tpu.matmul %149, %3, %cst_40 {dimension_numbers = #tpu.dot_dimension_numbers<[1], [0], [0], [1], [0, 0, 1, 1], [], []>} : vector<8x128xbf16>, vector<128x512xbf16>, vector<8x512xf32> -> vector<8x512xf32>
    %151 = arith.addf %148, %150 : vector<8x512xf32>
    %152 = vector.extract_strided_slice %151 {offsets = [0, 0], sizes = [8, 128], strides = [1, 1]} : vector<8x512xf32> to vector<8x128xf32>
    %153 = arith.negf %152 : vector<8x128xf32>
    %154 = math.exp %153 : vector<8x128xf32>
    %cst_41 = arith.constant 1.000000e+00 : f32
    %155 = vector.broadcast %cst_41 : f32 to vector<8x128xf32>
    %156 = arith.addf %155, %154 : vector<8x128xf32>
    %157 = arith.divf %155, %156 : vector<8x128xf32>
    %158 = vector.extract_strided_slice %151 {offsets = [0, 128], sizes = [8, 128], strides = [1, 1]} : vector<8x512xf32> to vector<8x128xf32>
    %159 = arith.negf %158 : vector<8x128xf32>
    %160 = math.exp %159 : vector<8x128xf32>
    %cst_42 = arith.constant 1.000000e+00 : f32
    %161 = vector.broadcast %cst_42 : f32 to vector<8x128xf32>
    %162 = arith.addf %161, %160 : vector<8x128xf32>
    %163 = arith.divf %161, %162 : vector<8x128xf32>
    %164 = vector.extract_strided_slice %151 {offsets = [0, 256], sizes = [8, 128], strides = [1, 1]} : vector<8x512xf32> to vector<8x128xf32>
    %165 = math.tanh %164 : vector<8x128xf32>
    %166 = vector.extract_strided_slice %151 {offsets = [0, 384], sizes = [8, 128], strides = [1, 1]} : vector<8x512xf32> to vector<8x128xf32>
    %167 = arith.negf %166 : vector<8x128xf32>
    %168 = math.exp %167 : vector<8x128xf32>
    %cst_43 = arith.constant 1.000000e+00 : f32
    %169 = vector.broadcast %cst_43 : f32 to vector<8x128xf32>
    %170 = arith.addf %169, %168 : vector<8x128xf32>
    %171 = arith.divf %169, %170 : vector<8x128xf32>
    %172 = arith.mulf %163, %139 : vector<8x128xf32>
    %173 = arith.mulf %157, %165 : vector<8x128xf32>
    %174 = arith.addf %172, %173 : vector<8x128xf32>
    %175 = math.tanh %174 : vector<8x128xf32>
    %176 = arith.mulf %171, %175 : vector<8x128xf32>
    %177 = arith.index_cast %c4_i32 : i32 to index
    %c0_44 = arith.constant 0 : index
    %c0_45 = arith.constant 0 : index
    %178 = vector.load %arg4[%177, %c0_44, %c0_45] : memref<8x8x128xf32, #tpu.memory_space<vmem>>, vector<1x8x128xf32>
    %179 = vector.shape_cast %178 : vector<1x8x128xf32> to vector<8x128xf32>
    %180 = vector.shape_cast %176 : vector<8x128xf32> to vector<1x8x128xf32>
    tpu.vector_store %arg4[%177, %c0_44, %c0_45], %180 {strides = array<i32>} : memref<8x8x128xf32, #tpu.memory_space<vmem>>, vector<1x8x128xf32>,
    %c5_i32 = arith.constant 5 : i32
    %181 = arith.index_cast %c5_i32 : i32 to index
    %c0_46 = arith.constant 0 : index
    %c0_47 = arith.constant 0 : index
    %182 = vector.load %arg2[%181, %c0_46, %c0_47] : memref<8x8x512xf32, #tpu.memory_space<vmem>>, vector<1x8x512xf32>
    %183 = vector.shape_cast %182 : vector<1x8x512xf32> to vector<8x512xf32>
    %184 = arith.truncf %176 : vector<8x128xf32> to vector<8x128xbf16>
    %cst_48 = arith.constant dense<0.000000e+00> : vector<8x512xf32>
    %185 = tpu.matmul %184, %3, %cst_48 {dimension_numbers = #tpu.dot_dimension_numbers<[1], [0], [0], [1], [0, 0, 1, 1], [], []>} : vector<8x128xbf16>, vector<128x512xbf16>, vector<8x512xf32> -> vector<8x512xf32>
    %186 = arith.addf %183, %185 : vector<8x512xf32>
    %187 = vector.extract_strided_slice %186 {offsets = [0, 0], sizes = [8, 128], strides = [1, 1]} : vector<8x512xf32> to vector<8x128xf32>
    %188 = arith.negf %187 : vector<8x128xf32>
    %189 = math.exp %188 : vector<8x128xf32>
    %cst_49 = arith.constant 1.000000e+00 : f32
    %190 = vector.broadcast %cst_49 : f32 to vector<8x128xf32>
    %191 = arith.addf %190, %189 : vector<8x128xf32>
    %192 = arith.divf %190, %191 : vector<8x128xf32>
    %193 = vector.extract_strided_slice %186 {offsets = [0, 128], sizes = [8, 128], strides = [1, 1]} : vector<8x512xf32> to vector<8x128xf32>
    %194 = arith.negf %193 : vector<8x128xf32>
    %195 = math.exp %194 : vector<8x128xf32>
    %cst_50 = arith.constant 1.000000e+00 : f32
    %196 = vector.broadcast %cst_50 : f32 to vector<8x128xf32>
    %197 = arith.addf %196, %195 : vector<8x128xf32>
    %198 = arith.divf %196, %197 : vector<8x128xf32>
    %199 = vector.extract_strided_slice %186 {offsets = [0, 256], sizes = [8, 128], strides = [1, 1]} : vector<8x512xf32> to vector<8x128xf32>
    %200 = math.tanh %199 : vector<8x128xf32>
    %201 = vector.extract_strided_slice %186 {offsets = [0, 384], sizes = [8, 128], strides = [1, 1]} : vector<8x512xf32> to vector<8x128xf32>
    %202 = arith.negf %201 : vector<8x128xf32>
    %203 = math.exp %202 : vector<8x128xf32>
    %cst_51 = arith.constant 1.000000e+00 : f32
    %204 = vector.broadcast %cst_51 : f32 to vector<8x128xf32>
    %205 = arith.addf %204, %203 : vector<8x128xf32>
    %206 = arith.divf %204, %205 : vector<8x128xf32>
    %207 = arith.mulf %198, %174 : vector<8x128xf32>
    %208 = arith.mulf %192, %200 : vector<8x128xf32>
    %209 = arith.addf %207, %208 : vector<8x128xf32>
    %210 = math.tanh %209 : vector<8x128xf32>
    %211 = arith.mulf %206, %210 : vector<8x128xf32>
    %212 = arith.index_cast %c5_i32 : i32 to index
    %c0_52 = arith.constant 0 : index
    %c0_53 = arith.constant 0 : index
    %213 = vector.load %arg4[%212, %c0_52, %c0_53] : memref<8x8x128xf32, #tpu.memory_space<vmem>>, vector<1x8x128xf32>
    %214 = vector.shape_cast %213 : vector<1x8x128xf32> to vector<8x128xf32>
    %215 = vector.shape_cast %211 : vector<8x128xf32> to vector<1x8x128xf32>
    tpu.vector_store %arg4[%212, %c0_52, %c0_53], %215 {strides = array<i32>} : memref<8x8x128xf32, #tpu.memory_space<vmem>>, vector<1x8x128xf32>,
    %c6_i32 = arith.constant 6 : i32
    %216 = arith.index_cast %c6_i32 : i32 to index
    %c0_54 = arith.constant 0 : index
    %c0_55 = arith.constant 0 : index
    %217 = vector.load %arg2[%216, %c0_54, %c0_55] : memref<8x8x512xf32, #tpu.memory_space<vmem>>, vector<1x8x512xf32>
    %218 = vector.shape_cast %217 : vector<1x8x512xf32> to vector<8x512xf32>
    %219 = arith.truncf %211 : vector<8x128xf32> to vector<8x128xbf16>
    %cst_56 = arith.constant dense<0.000000e+00> : vector<8x512xf32>
    %220 = tpu.matmul %219, %3, %cst_56 {dimension_numbers = #tpu.dot_dimension_numbers<[1], [0], [0], [1], [0, 0, 1, 1], [], []>} : vector<8x128xbf16>, vector<128x512xbf16>, vector<8x512xf32> -> vector<8x512xf32>
    %221 = arith.addf %218, %220 : vector<8x512xf32>
    %222 = vector.extract_strided_slice %221 {offsets = [0, 0], sizes = [8, 128], strides = [1, 1]} : vector<8x512xf32> to vector<8x128xf32>
    %223 = arith.negf %222 : vector<8x128xf32>
    %224 = math.exp %223 : vector<8x128xf32>
    %cst_57 = arith.constant 1.000000e+00 : f32
    %225 = vector.broadcast %cst_57 : f32 to vector<8x128xf32>
    %226 = arith.addf %225, %224 : vector<8x128xf32>
    %227 = arith.divf %225, %226 : vector<8x128xf32>
    %228 = vector.extract_strided_slice %221 {offsets = [0, 128], sizes = [8, 128], strides = [1, 1]} : vector<8x512xf32> to vector<8x128xf32>
    %229 = arith.negf %228 : vector<8x128xf32>
    %230 = math.exp %229 : vector<8x128xf32>
    %cst_58 = arith.constant 1.000000e+00 : f32
    %231 = vector.broadcast %cst_58 : f32 to vector<8x128xf32>
    %232 = arith.addf %231, %230 : vector<8x128xf32>
    %233 = arith.divf %231, %232 : vector<8x128xf32>
    %234 = vector.extract_strided_slice %221 {offsets = [0, 256], sizes = [8, 128], strides = [1, 1]} : vector<8x512xf32> to vector<8x128xf32>
    %235 = math.tanh %234 : vector<8x128xf32>
    %236 = vector.extract_strided_slice %221 {offsets = [0, 384], sizes = [8, 128], strides = [1, 1]} : vector<8x512xf32> to vector<8x128xf32>
    %237 = arith.negf %236 : vector<8x128xf32>
    %238 = math.exp %237 : vector<8x128xf32>
    %cst_59 = arith.constant 1.000000e+00 : f32
    %239 = vector.broadcast %cst_59 : f32 to vector<8x128xf32>
    %240 = arith.addf %239, %238 : vector<8x128xf32>
    %241 = arith.divf %239, %240 : vector<8x128xf32>
    %242 = arith.mulf %233, %209 : vector<8x128xf32>
    %243 = arith.mulf %227, %235 : vector<8x128xf32>
    %244 = arith.addf %242, %243 : vector<8x128xf32>
    %245 = math.tanh %244 : vector<8x128xf32>
    %246 = arith.mulf %241, %245 : vector<8x128xf32>
    %247 = arith.index_cast %c6_i32 : i32 to index
    %c0_60 = arith.constant 0 : index
    %c0_61 = arith.constant 0 : index
    %248 = vector.load %arg4[%247, %c0_60, %c0_61] : memref<8x8x128xf32, #tpu.memory_space<vmem>>, vector<1x8x128xf32>
    %249 = vector.shape_cast %248 : vector<1x8x128xf32> to vector<8x128xf32>
    %250 = vector.shape_cast %246 : vector<8x128xf32> to vector<1x8x128xf32>
    tpu.vector_store %arg4[%247, %c0_60, %c0_61], %250 {strides = array<i32>} : memref<8x8x128xf32, #tpu.memory_space<vmem>>, vector<1x8x128xf32>,
    %c7_i32 = arith.constant 7 : i32
    %251 = arith.index_cast %c7_i32 : i32 to index
    %c0_62 = arith.constant 0 : index
    %c0_63 = arith.constant 0 : index
    %252 = vector.load %arg2[%251, %c0_62, %c0_63] : memref<8x8x512xf32, #tpu.memory_space<vmem>>, vector<1x8x512xf32>
    %253 = vector.shape_cast %252 : vector<1x8x512xf32> to vector<8x512xf32>
    %254 = arith.truncf %246 : vector<8x128xf32> to vector<8x128xbf16>
    %cst_64 = arith.constant dense<0.000000e+00> : vector<8x512xf32>
    %255 = tpu.matmul %254, %3, %cst_64 {dimension_numbers = #tpu.dot_dimension_numbers<[1], [0], [0], [1], [0, 0, 1, 1], [], []>} : vector<8x128xbf16>, vector<128x512xbf16>, vector<8x512xf32> -> vector<8x512xf32>
    %256 = arith.addf %253, %255 : vector<8x512xf32>
    %257 = vector.extract_strided_slice %256 {offsets = [0, 0], sizes = [8, 128], strides = [1, 1]} : vector<8x512xf32> to vector<8x128xf32>
    %258 = arith.negf %257 : vector<8x128xf32>
    %259 = math.exp %258 : vector<8x128xf32>
    %cst_65 = arith.constant 1.000000e+00 : f32
    %260 = vector.broadcast %cst_65 : f32 to vector<8x128xf32>
    %261 = arith.addf %260, %259 : vector<8x128xf32>
    %262 = arith.divf %260, %261 : vector<8x128xf32>
    %263 = vector.extract_strided_slice %256 {offsets = [0, 128], sizes = [8, 128], strides = [1, 1]} : vector<8x512xf32> to vector<8x128xf32>
    %264 = arith.negf %263 : vector<8x128xf32>
    %265 = math.exp %264 : vector<8x128xf32>
    %cst_66 = arith.constant 1.000000e+00 : f32
    %266 = vector.broadcast %cst_66 : f32 to vector<8x128xf32>
    %267 = arith.addf %266, %265 : vector<8x128xf32>
    %268 = arith.divf %266, %267 : vector<8x128xf32>
    %269 = vector.extract_strided_slice %256 {offsets = [0, 256], sizes = [8, 128], strides = [1, 1]} : vector<8x512xf32> to vector<8x128xf32>
    %270 = math.tanh %269 : vector<8x128xf32>
    %271 = vector.extract_strided_slice %256 {offsets = [0, 384], sizes = [8, 128], strides = [1, 1]} : vector<8x512xf32> to vector<8x128xf32>
    %272 = arith.negf %271 : vector<8x128xf32>
    %273 = math.exp %272 : vector<8x128xf32>
    %cst_67 = arith.constant 1.000000e+00 : f32
    %274 = vector.broadcast %cst_67 : f32 to vector<8x128xf32>
    %275 = arith.addf %274, %273 : vector<8x128xf32>
    %276 = arith.divf %274, %275 : vector<8x128xf32>
    %277 = arith.mulf %268, %244 : vector<8x128xf32>
    %278 = arith.mulf %262, %270 : vector<8x128xf32>
    %279 = arith.addf %277, %278 : vector<8x128xf32>
    %280 = math.tanh %279 : vector<8x128xf32>
    %281 = arith.mulf %276, %280 : vector<8x128xf32>
    %282 = arith.index_cast %c7_i32 : i32 to index
    %c0_68 = arith.constant 0 : index
    %c0_69 = arith.constant 0 : index
    %283 = vector.load %arg4[%282, %c0_68, %c0_69] : memref<8x8x128xf32, #tpu.memory_space<vmem>>, vector<1x8x128xf32>
    %284 = vector.shape_cast %283 : vector<1x8x128xf32> to vector<8x128xf32>
    %285 = vector.shape_cast %281 : vector<8x128xf32> to vector<1x8x128xf32>
    tpu.vector_store %arg4[%282, %c0_68, %c0_69], %285 {strides = array<i32>} : memref<8x8x128xf32, #tpu.memory_space<vmem>>, vector<1x8x128xf32>,
    %c8_i32 = arith.constant 8 : i32
    %c0_70 = arith.constant 0 : index
    %c0_71 = arith.constant 0 : index
    %286 = vector.load %arg7[%c0_70, %c0_71] : memref<8x128xf32, #tpu.memory_space<vmem>>, vector<8x128xf32>
    tpu.vector_store %arg7[%c0_70, %c0_71], %281 {strides = array<i32>} : memref<8x128xf32, #tpu.memory_space<vmem>>, vector<8x128xf32>,
    %c0_72 = arith.constant 0 : index
    %c0_73 = arith.constant 0 : index
    %287 = vector.load %arg8[%c0_72, %c0_73] : memref<8x128xf32, #tpu.memory_space<vmem>>, vector<8x128xf32>
    tpu.vector_store %arg8[%c0_72, %c0_73], %279 {strides = array<i32>} : memref<8x128xf32, #tpu.memory_space<vmem>>, vector<8x128xf32>,
    %c0_i32_74 = arith.constant 0 : i32
    %288 = arith.cmpi eq, %arg1, %c0_i32_74 : i32
    %289 = arith.extui %288 : i1 to i32
    %c0_i32_75 = arith.constant 0 : i32
    %290 = arith.cmpi ne, %289, %c0_i32_75 : i32
    scf.if %290 {
      %c0_76 = arith.constant 0 : index
      %c0_77 = arith.constant 0 : index
      %291 = vector.load %arg5[%c0_76, %c0_77] : memref<8x128xf32, #tpu.memory_space<vmem>>, vector<8x128xf32>
      tpu.vector_store %arg5[%c0_76, %c0_77], %281 {strides = array<i32>} : memref<8x128xf32, #tpu.memory_space<vmem>>, vector<8x128xf32>,
      %c0_78 = arith.constant 0 : index
      %c0_79 = arith.constant 0 : index
      %292 = vector.load %arg6[%c0_78, %c0_79] : memref<8x128xf32, #tpu.memory_space<vmem>>, vector<8x128xf32>
      tpu.vector_store %arg6[%c0_78, %c0_79], %279 {strides = array<i32>} : memref<8x128xf32, #tpu.memory_space<vmem>>, vector<8x128xf32>,
    } else {
    }
    return
  }
  func.func @transform_0(%arg0: i32, %arg1: i32) -> (i32, i32, i32) {
    %c0_i32 = arith.constant 0 : i32
    %c0_i32_0 = arith.constant 0 : i32
    return %arg1, %arg0, %c0_i32 : i32, i32, i32
  }
  func.func @transform_1(%arg0: i32, %arg1: i32) -> (i32, i32) {
    %c0_i32 = arith.constant 0 : i32
    %c0_i32_0 = arith.constant 0 : i32
    %c0_i32_1 = arith.constant 0 : i32
    return %c0_i32, %c0_i32_0 : i32, i32
  }
  func.func @transform_2(%arg0: i32, %arg1: i32) -> (i32, i32, i32) {
    %c0_i32 = arith.constant 0 : i32
    %c0_i32_0 = arith.constant 0 : i32
    return %arg1, %arg0, %c0_i32 : i32, i32, i32
  }
  func.func @transform_3(%arg0: i32, %arg1: i32) -> (i32, i32) {
    %c0_i32 = arith.constant 0 : i32
    %c0_i32_0 = arith.constant 0 : i32
    return %arg0, %c0_i32 : i32, i32
  }
  func.func @transform_4(%arg0: i32, %arg1: i32) -> (i32, i32) {
    %c0_i32 = arith.constant 0 : i32
    %c0_i32_0 = arith.constant 0 : i32
    return %arg0, %c0_i32 : i32, i32
  }
}

</mosaic_0001>

<bundles_post_ra>
// kernel: tpu_custom_call.1
= control target key start
LH: loop header
LB: loop body
LE: loop exit
PB: predicated region body
PF: predicated region fallthrough
CT: control target
= control target key end

     0   :  { %10 = vsyncpa [#allocation5], 0  ;;  %s2172_s0 = inlined_call_operand.hbm [shape: f32[8,8,512], index: 0, kind: input, shape index: {}]   ;;  %s2173_s1 = inlined_call_operand.hbm [shape: bf16[128,512], index: 1, kind: input, shape index: {}]   ;;  %s2174_s2 = inlined_call_operand.hbm [shape: f32[8,8,128], index: 2, kind: output, shape index: {0}]   ;;  %s2175_s3 = inlined_call_operand.hbm [shape: f32[8,128], index: 3, kind: output, shape index: {1}]   ;;  %s2176_s4 = inlined_call_operand.hbm [shape: f32[8,128], index: 4, kind: output, shape index: {2}]  }
   0x1   :  { %11 = vsyncpa [#allocation8], 0 }
   0x2   :  { %12 = vsyncpa [#allocation6], 0 }
   0x3   :  { %13 = vsyncpa [#allocation11], 0  ;;  %s18_s17 = sshll.u32 %s2172_s0, 4  ;;  %s1772_s18 = smov [#allocation4]   ;;  %s19_s17 = int_to_ptr.hbm [resolvable:$true] %s18_s17 }
   0x4   :  { %s20_s19 = sshll.u32 %s1772_s18, 4  ;;  %s31_s22 = sshll.u32 %s2173_s1, 4  ;;  %s21_s19 = int_to_ptr.vmem [resolvable:$true] %s20_s19  ;;  %s32_s22 = int_to_ptr.hbm [resolvable:$true] %s31_s22 }
   0x5   :  { %s1773_s23 = smov 512   ;;  %s1774_s24 = smov 32  }
   0x6   :  { %26 = dma.hbm_to_vmem [thread:$0]  %s19_s17, 4096, %s21_s19, [#allocation5], %s1773_s23, %s1773_s23, %s1774_s24  }
   0x7   :  { %s1775_s25 = smov [#allocation7]   ;;  %s1776_s27 = smov 256  }
   0x8   :  { %s33_s26 = sshll.u32 %s1775_s25, 4  ;;  %s1777_s28 = smov 16   ;;  %s34_s26 = int_to_ptr.vmem [resolvable:$true] %s33_s26 }
   0x9   :  { %39 = dma.hbm_to_vmem [thread:$0]  %s32_s22, 4096, %s34_s26, [#allocation8], %s1776_s27, %s1776_s27, %s1777_s28  }
   0xa   :  { %1764 = dma.done.wait [#allocation5], 4096  }
   0xb   :  { %1765 = vsyncadd [#allocation5], 4294963200 }
   0xc   :  { %1766 = dma.done.wait [#allocation8], 4096  }
   0xd   :  { %1767 = vsyncadd [#allocation8], 4294963200  ;;  %v1434_v0 = vld [vmem:[#allocation7 + $0xe0] sm:$0xf]  ;;  %v1502_v1 = vld [vmem:[#allocation7 + $0xec] sm:$0xf0] }
   0xe   :  { %v1500_v2 = vld [vmem:[#allocation7 + $0xe4] sm:$0xf]  ;;  %v1815_v3 = vor.u32 %v1502_v1, %v1434_v0  ;;  %v1436_v4 = vld [vmem:[#allocation7 + $0xf0] sm:$0xf0]  ;;  %v1501_v5 = vld [vmem:[#allocation7 + $0xec] sm:$0xf] }
   0xf   :  { %v1444_v6 = vld [vmem:[#allocation7 + $0xf8] sm:$0xf0]  ;;  %v1817_v7 = vor.u32 %v1500_v2, %v1436_v4  ;;  %v1418_v9 = vld [vmem:[#allocation7 + $0xc0] sm:$0xf]  ;;  %v1498_v10 = vld [vmem:[#allocation7 + $0xcc] sm:$0xf0] }
  0x10   :  { %v1819_v8 = vor.u32 %v1501_v5, %v1444_v6  ;;  %v1496_v11 = vld [vmem:[#allocation7 + $0xc4] sm:$0xf]  ;;  %253 = vmatpush.bf16.msra.mxu0 %v1815_v3  ;;  %v1822_v12 = vor.u32 %v1498_v10, %v1418_v9  ;;  %v1420_v13 = vld [vmem:[#allocation7 + $0xd0] sm:$0xf0]  ;;  %v1497_v14 = vld [vmem:[#allocation7 + $0xcc] sm:$0xf] }
  0x11   :  { %v1428_v15 = vld [vmem:[#allocation7 + $0xd8] sm:$0xf0]  ;;  %266 = vmatpush.bf16.msra.mxu1 %v1817_v7  ;;  %v1826_v16 = vor.u32 %v1496_v11, %v1420_v13  ;;  %v1442_v18 = vld [vmem:[#allocation7 + $0xe8] sm:$0xf]  ;;  %v1503_v19 = vld [vmem:[#allocation7 + $0xf4] sm:$0xf0] }
  0x12   :  { %292 = vmatpush.bf16.msra.mxu3 %v1819_v8  ;;  %v1828_v17 = vor.u32 %v1497_v14, %v1428_v15  ;;  %v1402_v20 = vld [vmem:[#allocation7 + $0xa0] sm:$0xf]  ;;  %v1830_v21 = vor.u32 %v1503_v19, %v1442_v18  ;;  %v1494_v22 = vld [vmem:[#allocation7 + $0xac] sm:$0xf0]  ;;  %v1492_v23 = vld [vmem:[#allocation7 + $0xa4] sm:$0xf] }
  0x13   :  { %v1404_v24 = vld [vmem:[#allocation7 + $0xb0] sm:$0xf0]  ;;  %v1493_v25 = vld [vmem:[#allocation7 + $0xac] sm:$0xf]  ;;  %v1412_v26 = vld [vmem:[#allocation7 + $0xb8] sm:$0xf0]  ;;  %v1834_v28 = vor.u32 %v1494_v22, %v1402_v20 }
  0x14   :  { %v1426_v27 = vld [vmem:[#allocation7 + $0xc8] sm:$0xf]  ;;  %254 = vmatpush.bf16.msra.mxu0 %v1822_v12  ;;  %279 = vmatpush.bf16.msra.mxu2 %v1830_v21  ;;  %v1499_v29 = vld [vmem:[#allocation7 + $0xd4] sm:$0xf0]  ;;  %v1386_v30 = vld [vmem:[#allocation7 + $0x80] sm:$0xf]  ;;  %v1838_v32 = vor.u32 %v1492_v23, %v1404_v24  ;;  %v1840_v33 = vor.u32 %v1493_v25, %v1412_v26 }
  0x15   :  { %v1490_v31 = vld [vmem:[#allocation7 + $0x8c] sm:$0xf0]  ;;  %267 = vmatpush.bf16.msra.mxu1 %v1826_v16  ;;  %v1842_v34 = vor.u32 %v1499_v29, %v1426_v27  ;;  %v1488_v35 = vld [vmem:[#allocation7 + $0x84] sm:$0xf]  ;;  %v1388_v36 = vld [vmem:[#allocation7 + $0x90] sm:$0xf0] }
  0x16   :  { %293 = vmatpush.bf16.msra.mxu3 %v1828_v17  ;;  %v1489_v37 = vld [vmem:[#allocation7 + $0x8c] sm:$0xf]  ;;  %v1396_v38 = vld [vmem:[#allocation7 + $0x98] sm:$0xf0]  ;;  %v1410_v39 = vld [vmem:[#allocation7 + $0xa8] sm:$0xf]  ;;  %v1846_v41 = vor.u32 %v1490_v31, %v1386_v30  ;;  %v1852_v45 = vor.u32 %v1488_v35, %v1388_v36 }
  0x17   :  { %v1495_v40 = vld [vmem:[#allocation7 + $0xb4] sm:$0xf0]  ;;  %v1370_v43 = vld [vmem:[#allocation7 + $0x60] sm:$0xf]  ;;  %v1486_v44 = vld [vmem:[#allocation7 + $0x6c] sm:$0xf0]  ;;  %v1854_v46 = vor.u32 %v1489_v37, %v1396_v38 }
  0x18   :  { %255 = vmatpush.bf16.msra.mxu0 %v1834_v28  ;;  %280 = vmatpush.bf16.msra.mxu2 %v1842_v34  ;;  %v1848_v42 = vor.u32 %v1495_v40, %v1410_v39  ;;  %v1484_v47 = vld [vmem:[#allocation7 + $0x64] sm:$0xf]  ;;  %v1394_v48 = vld [vmem:[#allocation7 + $0x88] sm:$0xf]  ;;  %v1491_v49 = vld [vmem:[#allocation7 + $0x94] sm:$0xf0]  ;;  %v1858_v53 = vor.u32 %v1486_v44, %v1370_v43 }
  0x19   :  { %268 = vmatpush.bf16.msra.mxu1 %v1838_v32  ;;  %v1372_v50 = vld [vmem:[#allocation7 + $0x70] sm:$0xf0]  ;;  %v1485_v51 = vld [vmem:[#allocation7 + $0x6c] sm:$0xf]  ;;  %v1380_v52 = vld [vmem:[#allocation7 + $0x78] sm:$0xf0]  ;;  %v1860_v54 = vor.u32 %v1491_v49, %v1394_v48 }
  0x1a   :  { %294 = vmatpush.bf16.msra.mxu3 %v1840_v33  ;;  %v1354_v55 = vld [vmem:[#allocation7 + $0x40] sm:$0xf]  ;;  %v1482_v56 = vld [vmem:[#allocation7 + $0x4c] sm:$0xf0]  ;;  %v1864_v57 = vor.u32 %v1484_v47, %v1372_v50  ;;  %v1866_v58 = vor.u32 %v1485_v51, %v1380_v52  ;;  %v1480_v59 = vld [vmem:[#allocation7 + $0x44] sm:$0xf] }
  0x1b   :  { %v1378_v60 = vld [vmem:[#allocation7 + $0x68] sm:$0xf]  ;;  %v1487_v61 = vld [vmem:[#allocation7 + $0x74] sm:$0xf0]  ;;  %v1356_v62 = vld [vmem:[#allocation7 + $0x50] sm:$0xf0]  ;;  %v1870_v1 = vor.u32 %v1482_v56, %v1354_v55 }
  0x1c   :  { %256 = vmatpush.bf16.msra.mxu0 %v1846_v41  ;;  %281 = vmatpush.bf16.msra.mxu2 %v1848_v42  ;;  %v1481_v63 = vld [vmem:[#allocation7 + $0x4c] sm:$0xf]  ;;  %v1364_v0 = vld [vmem:[#allocation7 + $0x58] sm:$0xf0]  ;;  %v1872_v2 = vor.u32 %v1487_v61, %v1378_v60  ;;  %v1338_v4 = vld [vmem:[#allocation7 + $0x20] sm:$0xf]  ;;  %v1876_v6 = vor.u32 %v1480_v59, %v1356_v62 }
  0x1d   :  { %269 = vmatpush.bf16.msra.mxu1 %v1852_v45  ;;  %v1478_v5 = vld [vmem:[#allocation7 + $0x2c] sm:$0xf0]  ;;  %v1878_v9 = vor.u32 %v1481_v63, %v1364_v0  ;;  %v1476_v10 = vld [vmem:[#allocation7 + $0x24] sm:$0xf]  ;;  %v1362_v11 = vld [vmem:[#allocation7 + $0x48] sm:$0xf] }
  0x1e   :  { %295 = vmatpush.bf16.msra.mxu3 %v1854_v46  ;;  %v1483_v13 = vld [vmem:[#allocation7 + $0x54] sm:$0xf0]  ;;  %v1340_v14 = vld [vmem:[#allocation7 + $0x30] sm:$0xf0]  ;;  %v1477_v15 = vld [vmem:[#allocation7 + $0x2c] sm:$0xf]  ;;  %v1882_v19 = vor.u32 %v1478_v5, %v1338_v4 }
  0x1f   :  { %v1348_v18 = vld [vmem:[#allocation7 + $0x38] sm:$0xf0]  ;;  %v1884_v20 = vor.u32 %v1483_v13, %v1362_v11  ;;  %v1322_v22 = vld [vmem:[#allocation7] sm:$0xf]  ;;  %v1474_v23 = vld [vmem:[#allocation7 + $0xc] sm:$0xf0]  ;;  %v1888_v24 = vor.u32 %v1476_v10, %v1340_v14 }
  0x20   :  { %257 = vmatpush.bf16.msra.mxu0 %v1858_v53  ;;  %282 = vmatpush.bf16.msra.mxu2 %v1860_v54  ;;  %v1890_v25 = vor.u32 %v1477_v15, %v1348_v18  ;;  %v1472_v26 = vld [vmem:[#allocation7 + $0x4] sm:$0xf]  ;;  %v1346_v27 = vld [vmem:[#allocation7 + $0x28] sm:$0xf]  ;;  %v1479_v29 = vld [vmem:[#allocation7 + $0x34] sm:$0xf0]  ;;  %v1894_v36 = vor.u32 %v1474_v23, %v1322_v22 }
  0x21   :  { %270 = vmatpush.bf16.msra.mxu1 %v1864_v57  ;;  %v1324_v30 = vld [vmem:[#allocation7 + $0x10] sm:$0xf0]  ;;  %v1473_v31 = vld [vmem:[#allocation7 + $0xc] sm:$0xf]  ;;  %v1332_v35 = vld [vmem:[#allocation7 + $0x18] sm:$0xf0]  ;;  %v1896_v37 = vor.u32 %v1479_v29, %v1346_v27 }
  0x22   :  { %296 = vmatpush.bf16.msra.mxu3 %v1866_v58  ;;  %v1900_v38 = vor.u32 %v1472_v26, %v1324_v30  ;;  %v1902_v39 = vor.u32 %v1473_v31, %v1332_v35  ;;  %v1330_v40 = vld [vmem:[#allocation7 + $0x8] sm:$0xf]  ;;  %v1475_v43 = vld [vmem:[#allocation7 + $0x14] sm:$0xf0]  ;;  %v1778_v47 = vmov 0.0|0.0   ;;  %v88_v48 = vld [vmem:[#allocation4] sm:$0xff] }
  0x23   :  { %v1908_v44 = vor.u32 %v1475_v43, %v1330_v40  ;;  %v89_v49 = vld [vmem:[#allocation4 + $0x8] sm:$0xff]  ;;  %v91_v60 = vld [vmem:[#allocation4 + $0x18] sm:$0xff]  ;;  %v90_v15 = vld [vmem:[#allocation4 + $0x10] sm:$0xff]  ;;  %s1779_s0 = smov [#allocation9]   ;;  %s1275_s5 = sshll.u32 %s2174_s2, 4  ;;  %s1276_s5 = int_to_ptr.hbm [resolvable:$true] %s1275_s5 }
  0x24   :  { %258 = vmatpush.bf16.msra.mxu0 %v1870_v1  ;;  %283 = vmatpush.bf16.msra.mxu2 %v1872_v2  ;;  %s1273_s1 = sshll.u32 %s1779_s0, 4  ;;  %s1780_s6 = smov [#allocation10]   ;;  %s1274_s1 = int_to_ptr.vmem [resolvable:$true] %s1273_s1 }
  0x25   :  { %271 = vmatpush.bf16.msra.mxu1 %v1876_v6  ;;  %s1287_s7 = sshll.u32 %s1780_s6, 4  ;;  %s1289_s10 = sshll.u32 %s2175_s3, 4  ;;  %s1288_s7 = int_to_ptr.vmem [resolvable:$true] %s1287_s7  ;;  %s1290_s10 = int_to_ptr.hbm [resolvable:$true] %s1289_s10 }
  0x26   :  { %297 = vmatpush.bf16.msra.mxu3 %v1878_v9  ;;  %s1781_s11 = smov [#allocation12]   ;;  %s1300_s15 = sshll.u32 %s2176_s4, 4  ;;  %s1301_s15 = int_to_ptr.hbm [resolvable:$true] %s1300_s15 }
  0x27   :  { %s1298_s12 = sshll.u32 %s1781_s11, 4  ;;  %s1782_s2 = smov 128   ;;  %s1299_s12 = int_to_ptr.vmem [resolvable:$true] %s1298_s12 }
  0x28   :  { %259 = vmatpush.bf16.msra.mxu0 %v1882_v19  ;;  %284 = vmatpush.bf16.msra.mxu2 %v1884_v20  ;;  %s1783_s3 = smov 8  }
  0x29   :  { %272 = vmatpush.bf16.msra.mxu1 %v1888_v24 }
  0x2a   :  { %298 = vmatpush.bf16.msra.mxu3 %v1890_v25 }
  0x2c   :  { %260 = vmatpush.bf16.msra.mxu0 %v1894_v36  ;;  %285 = vmatpush.bf16.msra.mxu2 %v1896_v37 }
  0x2d   :  { %273 = vmatpush.bf16.msra.mxu1 %v1900_v38 }
  0x2e   :  { %299 = vmatpush.bf16.msra.mxu3 %v1902_v39 }
  0x2f   :  { %261 = vmatmul.bf16.vlgmr.msra.gmra.mxu0 %v1778_v47 }
  0x30   :  { %379 = vmatpush.bf16.msrb.mxu0 %v1815_v3  ;;  %274 = vmatmul.bf16.vlgmr.msra.gmra.mxu1 %v1778_v47 }
  0x31   :  { %392 = vmatpush.bf16.msrb.mxu1 %v1817_v7  ;;  %300 = vmatmul.bf16.vlgmr.msra.gmra.mxu3 %v1778_v47 }
  0x32   :  { %418 = vmatpush.bf16.msrb.mxu3 %v1819_v8  ;;  %286 = vmatpush.bf16.msra.mxu2 %v1908_v44 }
  0x34   :  { %380 = vmatpush.bf16.msrb.mxu0 %v1822_v12 }
  0x35   :  { %393 = vmatpush.bf16.msrb.mxu1 %v1826_v16  ;;  %287 = vmatmul.bf16.vlgmr.msra.gmra.mxu2 %v1778_v47 }
  0x36   :  { %405 = vmatpush.bf16.msrb.mxu2 %v1830_v21  ;;  %419 = vmatpush.bf16.msrb.mxu3 %v1828_v17 }
  0x38   :  { %381 = vmatpush.bf16.msrb.mxu0 %v1834_v28 }
  0x39   :  { %394 = vmatpush.bf16.msrb.mxu1 %v1838_v32 }
  0x3a   :  { %406 = vmatpush.bf16.msrb.mxu2 %v1842_v34  ;;  %420 = vmatpush.bf16.msrb.mxu3 %v1840_v33 }
  0x3c   :  { %382 = vmatpush.bf16.msrb.mxu0 %v1846_v41 }
  0x3d   :  { %395 = vmatpush.bf16.msrb.mxu1 %v1852_v45 }
  0x3e   :  { %407 = vmatpush.bf16.msrb.mxu2 %v1848_v42  ;;  %421 = vmatpush.bf16.msrb.mxu3 %v1854_v46 }
  0x40   :  { %383 = vmatpush.bf16.msrb.mxu0 %v1858_v53 }
  0x41   :  { %396 = vmatpush.bf16.msrb.mxu1 %v1864_v57 }
  0x42   :  { %408 = vmatpush.bf16.msrb.mxu2 %v1860_v54  ;;  %422 = vmatpush.bf16.msrb.mxu3 %v1866_v58 }
  0x44   :  { %384 = vmatpush.bf16.msrb.mxu0 %v1870_v1 }
  0x45   :  { %397 = vmatpush.bf16.msrb.mxu1 %v1876_v6 }
  0x46   :  { %409 = vmatpush.bf16.msrb.mxu2 %v1872_v2  ;;  %423 = vmatpush.bf16.msrb.mxu3 %v1878_v9 }
  0x48   :  { %385 = vmatpush.bf16.msrb.mxu0 %v1882_v19 }
  0x49   :  { %398 = vmatpush.bf16.msrb.mxu1 %v1888_v24 }
  0x4a   :  { %410 = vmatpush.bf16.msrb.mxu2 %v1884_v20  ;;  %424 = vmatpush.bf16.msrb.mxu3 %v1890_v25 }
  0x4c   :  { %386 = vmatpush.bf16.msrb.mxu0 %v1894_v36 }
  0x4d   :  { %399 = vmatpush.bf16.msrb.mxu1 %v1900_v38 }
  0x4e   :  { %411 = vmatpush.bf16.msrb.mxu2 %v1896_v37  ;;  %425 = vmatpush.bf16.msrb.mxu3 %v1902_v39 }
  0x50   :  { %506 = vmatpush.bf16.msra.mxu0 %v1815_v3 }
  0x51   :  { %519 = vmatpush.bf16.msra.mxu1 %v1817_v7 }
  0x52   :  { %545 = vmatpush.bf16.msra.mxu3 %v1819_v8  ;;  %412 = vmatpush.bf16.msrb.mxu2 %v1908_v44 }
  0x54   :  { %507 = vmatpush.bf16.msra.mxu0 %v1822_v12 }
  0x55   :  { %520 = vmatpush.bf16.msra.mxu1 %v1826_v16 }
  0x56   :  { %532 = vmatpush.bf16.msra.mxu2 %v1830_v21  ;;  %546 = vmatpush.bf16.msra.mxu3 %v1828_v17 }
  0x58   :  { %508 = vmatpush.bf16.msra.mxu0 %v1834_v28 }
  0x59   :  { %521 = vmatpush.bf16.msra.mxu1 %v1838_v32 }
  0x5a   :  { %533 = vmatpush.bf16.msra.mxu2 %v1842_v34  ;;  %547 = vmatpush.bf16.msra.mxu3 %v1840_v33 }
  0x5c   :  { %509 = vmatpush.bf16.msra.mxu0 %v1846_v41 }
  0x5d   :  { %522 = vmatpush.bf16.msra.mxu1 %v1852_v45 }
  0x5e   :  { %534 = vmatpush.bf16.msra.mxu2 %v1848_v42  ;;  %548 = vmatpush.bf16.msra.mxu3 %v1854_v46 }
  0x60   :  { %510 = vmatpush.bf16.msra.mxu0 %v1858_v53 }
  0x61   :  { %523 = vmatpush.bf16.msra.mxu1 %v1864_v57 }
  0x62   :  { %535 = vmatpush.bf16.msra.mxu2 %v1860_v54  ;;  %549 = vmatpush.bf16.msra.mxu3 %v1866_v58 }
  0x64   :  { %511 = vmatpush.bf16.msra.mxu0 %v1870_v1 }
  0x65   :  { %524 = vmatpush.bf16.msra.mxu1 %v1876_v6 }
  0x66   :  { %536 = vmatpush.bf16.msra.mxu2 %v1872_v2  ;;  %550 = vmatpush.bf16.msra.mxu3 %v1878_v9 }
  0x68   :  { %512 = vmatpush.bf16.msra.mxu0 %v1882_v19 }
  0x69   :  { %525 = vmatpush.bf16.msra.mxu1 %v1888_v24 }
  0x6a   :  { %537 = vmatpush.bf16.msra.mxu2 %v1884_v20  ;;  %551 = vmatpush.bf16.msra.mxu3 %v1890_v25 }
  0x6c   :  { %513 = vmatpush.bf16.msra.mxu0 %v1894_v36 }
  0x6d   :  { %526 = vmatpush.bf16.msra.mxu1 %v1900_v38 }
  0x6e   :  { %538 = vmatpush.bf16.msra.mxu2 %v1896_v37  ;;  %552 = vmatpush.bf16.msra.mxu3 %v1902_v39 }
  0x72   :  { %539 = vmatpush.bf16.msra.mxu2 %v1908_v44 }
  0xac   :  { %v262_v50 = vpop.f32.mrf.mxu0 }
  0xad   :  { %v305_v51 = vadd.f32 %v262_v50, %v88_v48  ;;  %v275_v52 = vpop.f32.mrf.mxu1 }
  0xae   :  { %v306_v55 = vadd.f32 %v275_v52, %v89_v49 }
  0xaf   :  { %v1448_v56 = vmul.f32 -1.442695, %v305_v51 }
  0xb0   :  { %v1449_v59 = vmul.f32 -1.442695, %v306_v55 }
  0xb1   :  { %1516 = vpow2.f32 %v1448_v56 }
  0xb2   :  { %1518 = vpow2.f32 %v1449_v59 }
  0xb4   :  { %v301_v61 = vpop.f32.mrf.mxu3  ;;  %v264_v63 = vpop.f32.mrf.mxu0 }
  0xb5   :  { %v308_v62 = vadd.f32 %v301_v61, %v91_v60  ;;  %v277_v0 = vpop.f32.mrf.mxu1 }
  0xb7   :  { %v1450_v4 = vmul.f32 -1.442695, %v308_v62  ;;  %v1517_v5 = vpop.eup %1516 }
  0xb8   :  { %v288_v10 = vpop.f32.mrf.mxu2  ;;  %v1519_v11 = vpop.eup %1518  ;;  %v312_v13 = vadd.f32 1.0, %v1517_v5 }
  0xb9   :  { %1520 = vpow2.f32 %v1450_v4  ;;  %v331_v14 = vadd.f32 1.0, %v1519_v11  ;;  %v307_v23 = vadd.f32 %v288_v10, %v90_v15 }
  0xba   :  { %1522 = vrcp.f32 %v312_v13  ;;  %v324_v47 = vand.u32 2147483648, %v312_v13  ;;  %v322_v50 = vand.u32 2147483647, %v312_v13  ;;  %vm318_vm2 = vweird.f32 %v312_v13 }
  0xbb   :  { %1524 = vrcp.f32 %v331_v14  ;;  %v343_v48 = vand.u32 2147483648, %v331_v14  ;;  %v341_v52 = vand.u32 2147483647, %v331_v14  ;;  %vm337_vm3 = vweird.f32 %v331_v14 }
  0xbc   :  { %v303_v18 = vpop.f32.mrf.mxu3  ;;  %v325_v61 = vor.u32 1.1754944e-38, %v324_v47  ;;  %vm323_vm5 = vcmp.eq.f32.partialorder %v322_v50, 8.507059e+37  ;;  %v375_v47 = vld [vmem:[#allocation4 + $0x28] sm:$0xff] }
  0xbd   :  { %v344_v63 = vor.u32 1.1754944e-38, %v343_v48  ;;  %vm342_vm7 = vcmp.eq.f32.partialorder %v341_v52, 8.507059e+37 }
  0xbf   :  { %v1521_v22 = vpop.eup %1520 }
  0xc0   :  { %v351_v26 = vadd.f32 1.0, %v1521_v22  ;;  %v290_v27 = vpop.f32.mrf.mxu2  ;;  %v1523_v29 = vpop.eup %1522 }
  0xc1   :  { %v1525_v30 = vpop.eup %1524  ;;  %v314_v31 = vmul.f32 %v1523_v29, %v312_v13  ;;  %vm319_vm0 = vweird.f32 %v1523_v29 }
  0xc2   :  { %1526 = vrcp.f32 %v351_v26  ;;  %v333_v35 = vmul.f32 %v1525_v30, %v331_v14  ;;  %vm338_vm1 = vweird.f32 %v1525_v30  ;;  %vm320_vm4 = vmor %vm318_vm2, %vm319_vm0  ;;  %v363_v14 = vand.u32 2147483648, %v351_v26 }
  0xc3   :  { %1528 = vtanh.f32 %v307_v23  ;;  %v315_v40 = vsub.f32 1.0, %v314_v31  ;;  %vm339_vm6 = vmor %vm337_vm3, %vm338_vm1  ;;  %vm357_vm9 = vweird.f32 %v351_v26  ;;  %v361_v27 = vand.u32 2147483647, %v351_v26 }
  0xc4   :  { %v334_v43 = vsub.f32 1.0, %v333_v35  ;;  %v364_v31 = vor.u32 1.1754944e-38, %v363_v14 }
  0xc5   :  { %v316_v49 = vmul.f32 %v1523_v29, %v315_v40  ;;  %vm362_vm11 = vcmp.eq.f32.partialorder %v361_v27, 8.507059e+37 }
  0xc6   :  { %v335_v51 = vmul.f32 %v1525_v30, %v334_v43 }
  0xc7   :  { %v317_v56 = vadd.f32 %v1523_v29, %v316_v49 }
  0xc8   :  { %v1527_v55 = vpop.eup %1526  ;;  %v336_v62 = vadd.f32 %v1525_v30, %v335_v51 }
  0xc9   :  { %v1529_v59 = vpop.eup %1528  ;;  %v353_v60 = vmul.f32 %v1527_v55, %v351_v26  ;;  %v321_v0 = vsel %vm320_vm4, %v1523_v29, %v317_v56  ;;  %vm358_vm8 = vweird.f32 %v1527_v55  ;;  %v374_v26 = vld [vmem:[#allocation4 + $0x20] sm:$0xff]  ;;  %v377_v56 = vld [vmem:[#allocation4 + $0x38] sm:$0xff] }
  0xca   :  { %v326_v5 = vsel %vm323_vm5, %v325_v61, %v321_v0  ;;  %v340_v10 = vsel %vm339_vm6, %v1525_v30, %v336_v62  ;;  %vm359_vm10 = vmor %vm357_vm9, %vm358_vm8 }
  0xcb   :  { %v354_v4 = vsub.f32 1.0, %v353_v60  ;;  %v345_v11 = vsel %vm342_vm7, %v344_v63, %v340_v10  ;;  %v368_v15 = vmul.f32 %v1529_v59, %v326_v5 }
  0xcc   :  { %v367_v22 = vmul.f32 0.0, %v345_v11 }
  0xcd   :  { %v355_v18 = vmul.f32 %v1527_v55, %v354_v4 }
  0xce   :  { %v1975_v23 = vadd.f32 %v368_v15, %v367_v22  ;;  %v376_v22 = vld [vmem:[#allocation4 + $0x30] sm:$0xff] }
  0xcf   :  { %v356_v13 = vadd.f32 %v1527_v55, %v355_v18 }
  0xd0   :  { %1530 = vtanh.f32 %v1975_v23 }
  0xd1   :  { %v360_v29 = vsel %vm359_vm10, %v1527_v55, %v356_v13 }
  0xd2   :  { %v365_v30 = vsel %vm362_vm11, %v364_v31, %v360_v29 }
  0xd6   :  { %v1531_v35 = vpop.eup %1530 }
  0xd7   :  { %v371_v40 = vmul.f32 %v1531_v35, %v365_v30 }
  0xd9   :  { %372 = vst [vmem:[#allocation9] sm:$0xff] %v371_v40  ;;  %v378_v43 = vpack.c.bf16 %v371_v40, %v371_v40 }
  0xdb   :  { %387 = vmatmul.bf16.vlgmr.msrb.gmra.mxu0 %v378_v43  ;;  %400 = vmatmul.bf16.vlgmr.msrb.gmra.mxu1 %v378_v43 }
  0xdc   :  { %413 = vmatmul.bf16.vlgmr.msrb.gmra.mxu2 %v378_v43  ;;  %426 = vmatmul.bf16.vlgmr.msrb.gmra.mxu3 %v378_v43 }
  0xdd   :  { %633 = vmatpush.bf16.msrb.mxu0 %v1815_v3  ;;  %646 = vmatpush.bf16.msrb.mxu1 %v1817_v7 }
  0xde   :  { %659 = vmatpush.bf16.msrb.mxu2 %v1830_v21  ;;  %672 = vmatpush.bf16.msrb.mxu3 %v1819_v8 }
  0xe1   :  { %634 = vmatpush.bf16.msrb.mxu0 %v1822_v12  ;;  %647 = vmatpush.bf16.msrb.mxu1 %v1826_v16 }
  0xe2   :  { %660 = vmatpush.bf16.msrb.mxu2 %v1842_v34  ;;  %673 = vmatpush.bf16.msrb.mxu3 %v1828_v17 }
  0xe5   :  { %635 = vmatpush.bf16.msrb.mxu0 %v1834_v28  ;;  %648 = vmatpush.bf16.msrb.mxu1 %v1838_v32 }
  0xe6   :  { %661 = vmatpush.bf16.msrb.mxu2 %v1848_v42  ;;  %674 = vmatpush.bf16.msrb.mxu3 %v1840_v33 }
  0xe9   :  { %636 = vmatpush.bf16.msrb.mxu0 %v1846_v41  ;;  %649 = vmatpush.bf16.msrb.mxu1 %v1852_v45 }
  0xea   :  { %662 = vmatpush.bf16.msrb.mxu2 %v1860_v54  ;;  %675 = vmatpush.bf16.msrb.mxu3 %v1854_v46 }
  0xed   :  { %637 = vmatpush.bf16.msrb.mxu0 %v1858_v53  ;;  %650 = vmatpush.bf16.msrb.mxu1 %v1864_v57 }
  0xee   :  { %663 = vmatpush.bf16.msrb.mxu2 %v1872_v2  ;;  %676 = vmatpush.bf16.msrb.mxu3 %v1866_v58 }
  0xf1   :  { %638 = vmatpush.bf16.msrb.mxu0 %v1870_v1  ;;  %651 = vmatpush.bf16.msrb.mxu1 %v1876_v6 }
  0xf2   :  { %664 = vmatpush.bf16.msrb.mxu2 %v1884_v20  ;;  %677 = vmatpush.bf16.msrb.mxu3 %v1878_v9 }
  0xf5   :  { %639 = vmatpush.bf16.msrb.mxu0 %v1882_v19  ;;  %652 = vmatpush.bf16.msrb.mxu1 %v1888_v24 }
  0xf6   :  { %665 = vmatpush.bf16.msrb.mxu2 %v1896_v37  ;;  %678 = vmatpush.bf16.msrb.mxu3 %v1890_v25 }
  0xf9   :  { %640 = vmatpush.bf16.msrb.mxu0 %v1894_v36  ;;  %653 = vmatpush.bf16.msrb.mxu1 %v1900_v38 }
  0xfa   :  { %666 = vmatpush.bf16.msrb.mxu2 %v1908_v44  ;;  %679 = vmatpush.bf16.msrb.mxu3 %v1902_v39 }
 0x158   :  { %v388_v48 = vpop.f32.mrf.mxu0  ;;  %v401_v49 = vpop.f32.mrf.mxu1 }
 0x159   :  { %v431_v50 = vadd.f32 %v388_v48, %v374_v26  ;;  %v432_v51 = vadd.f32 %v401_v49, %v375_v47 }
 0x15b   :  { %v1451_v52 = vmul.f32 -1.442695, %v431_v50  ;;  %v1452_v55 = vmul.f32 -1.442695, %v432_v51 }
 0x15d   :  { %1532 = vpow2.f32 %v1451_v52 }
 0x15e   :  { %1534 = vpow2.f32 %v1452_v55 }
 0x15f   :  { %v414_v59 = vpop.f32.mrf.mxu2  ;;  %v427_v60 = vpop.f32.mrf.mxu3 }
 0x160   :  { %v434_v61 = vadd.f32 %v427_v60, %v377_v56  ;;  %v390_v62 = vpop.f32.mrf.mxu0  ;;  %v403_v63 = vpop.f32.mrf.mxu1  ;;  %v433_v29 = vadd.f32 %v414_v59, %v376_v22 }
 0x162   :  { %v1453_v0 = vmul.f32 -1.442695, %v434_v61 }
 0x163   :  { %v1533_v4 = vpop.eup %1532 }
 0x164   :  { %v1535_v5 = vpop.eup %1534  ;;  %v438_v10 = vadd.f32 1.0, %v1533_v4  ;;  %1536 = vpow2.f32 %v1453_v0 }
 0x165   :  { %v457_v11 = vadd.f32 1.0, %v1535_v5 }
 0x166   :  { %1538 = vrcp.f32 %v438_v10  ;;  %v450_v26 = vand.u32 2147483648, %v438_v10  ;;  %v448_v49 = vand.u32 2147483647, %v438_v10  ;;  %vm444_vm14 = vweird.f32 %v438_v10 }
 0x167   :  { %1540 = vrcp.f32 %v457_v11  ;;  %v416_v15 = vpop.f32.mrf.mxu2  ;;  %v429_v18 = vpop.f32.mrf.mxu3  ;;  %v469_v47 = vand.u32 2147483648, %v457_v11  ;;  %v467_v51 = vand.u32 2147483647, %v457_v11  ;;  %vm463_vm15 = vweird.f32 %v457_v11 }
 0x168   :  { %v451_v56 = vor.u32 1.1754944e-38, %v450_v26  ;;  %vm449_vm2 = vcmp.eq.f32.partialorder %v448_v49, 8.507059e+37 }
 0x169   :  { %v470_v61 = vor.u32 1.1754944e-38, %v469_v47  ;;  %vm468_vm3 = vcmp.eq.f32.partialorder %v467_v51, 8.507059e+37 }
 0x16a   :  { %v1537_v13 = vpop.eup %1536 }
 0x16b   :  { %v477_v14 = vadd.f32 1.0, %v1537_v13 }
 0x16c   :  { %v1539_v27 = vpop.eup %1538 }
 0x16d   :  { %v1541_v31 = vpop.eup %1540  ;;  %v440_v35 = vmul.f32 %v1539_v27, %v438_v10  ;;  %1542 = vrcp.f32 %v477_v14  ;;  %vm445_vm12 = vweird.f32 %v1539_v27  ;;  %vm483_vm5 = vweird.f32 %v477_v14 }
 0x16e   :  { %v459_v30 = vmul.f32 %v1541_v31, %v457_v11  ;;  %1544 = vtanh.f32 %v433_v29  ;;  %vm464_vm13 = vweird.f32 %v1541_v31  ;;  %vm446_vm0 = vmor %vm444_vm14, %vm445_vm12  ;;  %v489_v29 = vand.u32 2147483648, %v477_v14 }
 0x16f   :  { %v441_v40 = vsub.f32 1.0, %v440_v35  ;;  %vm465_vm1 = vmor %vm463_vm15, %vm464_vm13 }
 0x170   :  { %v460_v43 = vsub.f32 1.0, %v459_v30  ;;  %v490_v30 = vor.u32 1.1754944e-38, %v489_v29 }
 0x171   :  { %v442_v48 = vmul.f32 %v1539_v27, %v441_v40 }
 0x172   :  { %v461_v50 = vmul.f32 %v1541_v31, %v460_v43 }
 0x173   :  { %v1543_v52 = vpop.eup %1542  ;;  %v443_v55 = vadd.f32 %v1539_v27, %v442_v48 }
 0x174   :  { %v462_v59 = vadd.f32 %v1541_v31, %v461_v50  ;;  %v479_v60 = vmul.f32 %v1543_v52, %v477_v14  ;;  %v1545_v63 = vpop.eup %1544  ;;  %vm484_vm4 = vweird.f32 %v1543_v52 }
 0x175   :  { %v447_v62 = vsel %vm446_vm0, %v1539_v27, %v443_v55  ;;  %v487_v27 = vand.u32 2147483647, %v477_v14  ;;  %vm485_vm6 = vmor %vm483_vm5, %vm484_vm4  ;;  %v502_v14 = vld [vmem:[#allocation4 + $0x48] sm:$0xff]  ;;  %v504_v55 = vld [vmem:[#allocation4 + $0x58] sm:$0xff] }
 0x176   :  { %v452_v0 = vsel %vm449_vm2, %v451_v56, %v447_v62  ;;  %v466_v4 = vsel %vm465_vm1, %v1541_v31, %v462_v59  ;;  %v480_v5 = vsub.f32 1.0, %v479_v60 }
 0x177   :  { %v471_v15 = vsel %vm468_vm3, %v470_v61, %v466_v4  ;;  %v494_v18 = vmul.f32 %v1545_v63, %v452_v0  ;;  %vm488_vm7 = vcmp.eq.f32.partialorder %v487_v27, 8.507059e+37 }
 0x178   :  { %v493_v22 = vmul.f32 %v471_v15, %v1975_v23  ;;  %v481_v13 = vmul.f32 %v1543_v52, %v480_v5  ;;  %v501_v23 = vld [vmem:[#allocation4 + $0x40] sm:$0xff] }
 0x17a   :  { %v2011_v10 = vadd.f32 %v494_v18, %v493_v22  ;;  %v482_v11 = vadd.f32 %v1543_v52, %v481_v13  ;;  %v503_v13 = vld [vmem:[#allocation4 + $0x50] sm:$0xff] }
 0x17c   :  { %1546 = vtanh.f32 %v2011_v10  ;;  %v486_v35 = vsel %vm485_vm6, %v1543_v52, %v482_v11 }
 0x17d   :  { %v491_v40 = vsel %vm488_vm7, %v490_v30, %v486_v35 }
 0x182   :  { %v1547_v31 = vpop.eup %1546 }
 0x183   :  { %v497_v43 = vmul.f32 %v1547_v31, %v491_v40 }
 0x185   :  { %499 = vst [vmem:[#allocation9 + $0x8] sm:$0xff] %v497_v43  ;;  %v505_v26 = vpack.c.bf16 %v497_v43, %v497_v43 }
 0x187   :  { %514 = vmatmul.bf16.vlgmr.msra.gmra.mxu0 %v505_v26  ;;  %527 = vmatmul.bf16.vlgmr.msra.gmra.mxu1 %v505_v26 }
 0x188   :  { %540 = vmatmul.bf16.vlgmr.msra.gmra.mxu2 %v505_v26  ;;  %553 = vmatmul.bf16.vlgmr.msra.gmra.mxu3 %v505_v26 }
 0x189   :  { %760 = vmatpush.bf16.msra.mxu0 %v1815_v3  ;;  %773 = vmatpush.bf16.msra.mxu1 %v1817_v7 }
 0x18a   :  { %786 = vmatpush.bf16.msra.mxu2 %v1830_v21  ;;  %799 = vmatpush.bf16.msra.mxu3 %v1819_v8 }
 0x18d   :  { %761 = vmatpush.bf16.msra.mxu0 %v1822_v12  ;;  %774 = vmatpush.bf16.msra.mxu1 %v1826_v16 }
 0x18e   :  { %787 = vmatpush.bf16.msra.mxu2 %v1842_v34  ;;  %800 = vmatpush.bf16.msra.mxu3 %v1828_v17 }
 0x191   :  { %762 = vmatpush.bf16.msra.mxu0 %v1834_v28  ;;  %775 = vmatpush.bf16.msra.mxu1 %v1838_v32 }
 0x192   :  { %788 = vmatpush.bf16.msra.mxu2 %v1848_v42  ;;  %801 = vmatpush.bf16.msra.mxu3 %v1840_v33 }
 0x195   :  { %763 = vmatpush.bf16.msra.mxu0 %v1846_v41  ;;  %776 = vmatpush.bf16.msra.mxu1 %v1852_v45 }
 0x196   :  { %789 = vmatpush.bf16.msra.mxu2 %v1860_v54  ;;  %802 = vmatpush.bf16.msra.mxu3 %v1854_v46 }
 0x199   :  { %764 = vmatpush.bf16.msra.mxu0 %v1858_v53  ;;  %777 = vmatpush.bf16.msra.mxu1 %v1864_v57 }
 0x19a   :  { %790 = vmatpush.bf16.msra.mxu2 %v1872_v2  ;;  %803 = vmatpush.bf16.msra.mxu3 %v1866_v58 }
 0x19d   :  { %765 = vmatpush.bf16.msra.mxu0 %v1870_v1  ;;  %778 = vmatpush.bf16.msra.mxu1 %v1876_v6 }
 0x19e   :  { %791 = vmatpush.bf16.msra.mxu2 %v1884_v20  ;;  %804 = vmatpush.bf16.msra.mxu3 %v1878_v9 }
 0x1a1   :  { %766 = vmatpush.bf16.msra.mxu0 %v1882_v19  ;;  %779 = vmatpush.bf16.msra.mxu1 %v1888_v24 }
 0x1a2   :  { %792 = vmatpush.bf16.msra.mxu2 %v1896_v37  ;;  %805 = vmatpush.bf16.msra.mxu3 %v1890_v25 }
 0x1a5   :  { %767 = vmatpush.bf16.msra.mxu0 %v1894_v36  ;;  %780 = vmatpush.bf16.msra.mxu1 %v1900_v38 }
 0x1a6   :  { %793 = vmatpush.bf16.msra.mxu2 %v1908_v44  ;;  %806 = vmatpush.bf16.msra.mxu3 %v1902_v39 }
 0x204   :  { %v515_v47 = vpop.f32.mrf.mxu0  ;;  %v528_v48 = vpop.f32.mrf.mxu1 }
 0x205   :  { %v558_v49 = vadd.f32 %v515_v47, %v501_v23  ;;  %v559_v50 = vadd.f32 %v528_v48, %v502_v14 }
 0x207   :  { %v1454_v51 = vmul.f32 -1.442695, %v558_v49  ;;  %v1455_v52 = vmul.f32 -1.442695, %v559_v50 }
 0x209   :  { %1548 = vpow2.f32 %v1454_v51 }
 0x20a   :  { %1550 = vpow2.f32 %v1455_v52 }
 0x20b   :  { %v541_v56 = vpop.f32.mrf.mxu2  ;;  %v554_v59 = vpop.f32.mrf.mxu3 }
 0x20c   :  { %v561_v60 = vadd.f32 %v554_v59, %v504_v55  ;;  %v517_v61 = vpop.f32.mrf.mxu0  ;;  %v530_v62 = vpop.f32.mrf.mxu1  ;;  %v560_v35 = vadd.f32 %v541_v56, %v503_v13 }
 0x20e   :  { %v1456_v63 = vmul.f32 -1.442695, %v561_v60 }
 0x20f   :  { %v1549_v0 = vpop.eup %1548 }
 0x210   :  { %v1551_v4 = vpop.eup %1550  ;;  %v565_v5 = vadd.f32 1.0, %v1549_v0  ;;  %1552 = vpow2.f32 %v1456_v63 }
 0x211   :  { %v584_v15 = vadd.f32 1.0, %v1551_v4 }
 0x212   :  { %1554 = vrcp.f32 %v565_v5  ;;  %v577_v23 = vand.u32 2147483648, %v565_v5  ;;  %v575_v48 = vand.u32 2147483647, %v565_v5  ;;  %vm571_vm10 = vweird.f32 %v565_v5 }
 0x213   :  { %1556 = vrcp.f32 %v584_v15  ;;  %v543_v18 = vpop.f32.mrf.mxu2  ;;  %v556_v22 = vpop.f32.mrf.mxu3  ;;  %v596_v14 = vand.u32 2147483648, %v584_v15  ;;  %v594_v50 = vand.u32 2147483647, %v584_v15  ;;  %vm590_vm11 = vweird.f32 %v584_v15 }
 0x214   :  { %v578_v55 = vor.u32 1.1754944e-38, %v577_v23  ;;  %vm576_vm14 = vcmp.eq.f32.partialorder %v575_v48, 8.507059e+37 }
 0x215   :  { %v597_v60 = vor.u32 1.1754944e-38, %v596_v14  ;;  %vm595_vm15 = vcmp.eq.f32.partialorder %v594_v50, 8.507059e+37 }
 0x216   :  { %v1553_v11 = vpop.eup %1552 }
 0x217   :  { %v604_v29 = vadd.f32 1.0, %v1553_v11 }
 0x218   :  { %v1555_v27 = vpop.eup %1554 }
 0x219   :  { %v1557_v30 = vpop.eup %1556  ;;  %v567_v31 = vmul.f32 %v1555_v27, %v565_v5  ;;  %1558 = vrcp.f32 %v604_v29  ;;  %vm572_vm8 = vweird.f32 %v1555_v27  ;;  %vm610_vm1 = vweird.f32 %v604_v29 }
 0x21a   :  { %v586_v40 = vmul.f32 %v1557_v30, %v584_v15  ;;  %1560 = vtanh.f32 %v560_v35  ;;  %vm591_vm9 = vweird.f32 %v1557_v30  ;;  %vm573_vm12 = vmor %vm571_vm10, %vm572_vm8  ;;  %v616_v35 = vand.u32 2147483648, %v604_v29 }
 0x21b   :  { %v568_v43 = vsub.f32 1.0, %v567_v31  ;;  %vm592_vm13 = vmor %vm590_vm11, %vm591_vm9 }
 0x21c   :  { %v587_v26 = vsub.f32 1.0, %v586_v40  ;;  %v617_v40 = vor.u32 1.1754944e-38, %v616_v35 }
 0x21d   :  { %v569_v47 = vmul.f32 %v1555_v27, %v568_v43 }
 0x21e   :  { %v588_v49 = vmul.f32 %v1557_v30, %v587_v26 }
 0x21f   :  { %v1559_v51 = vpop.eup %1558  ;;  %v570_v52 = vadd.f32 %v1555_v27, %v569_v47 }
 0x220   :  { %v589_v56 = vadd.f32 %v1557_v30, %v588_v49  ;;  %v606_v59 = vmul.f32 %v1559_v51, %v604_v29  ;;  %v1561_v62 = vpop.eup %1560  ;;  %vm611_vm0 = vweird.f32 %v1559_v51 }
 0x221   :  { %v574_v61 = vsel %vm573_vm12, %v1555_v27, %v570_v52  ;;  %v614_v27 = vand.u32 2147483647, %v604_v29  ;;  %vm612_vm2 = vmor %vm610_vm1, %vm611_vm0  ;;  %v629_v29 = vld [vmem:[#allocation4 + $0x68] sm:$0xff]  ;;  %v631_v52 = vld [vmem:[#allocation4 + $0x78] sm:$0xff] }
 0x222   :  { %v579_v63 = vsel %vm576_vm14, %v578_v55, %v574_v61  ;;  %v593_v0 = vsel %vm592_vm13, %v1557_v30, %v589_v56  ;;  %v607_v4 = vsub.f32 1.0, %v606_v59 }
 0x223   :  { %v598_v18 = vsel %vm595_vm15, %v597_v60, %v593_v0  ;;  %v621_v22 = vmul.f32 %v1561_v62, %v579_v63  ;;  %vm615_vm3 = vcmp.eq.f32.partialorder %v614_v27, 8.507059e+37 }
 0x224   :  { %v620_v13 = vmul.f32 %v598_v18, %v2011_v10  ;;  %v608_v11 = vmul.f32 %v1559_v51, %v607_v4  ;;  %v628_v10 = vld [vmem:[#allocation4 + $0x60] sm:$0xff] }
 0x226   :  { %v2047_v5 = vadd.f32 %v621_v22, %v620_v13  ;;  %v609_v15 = vadd.f32 %v1559_v51, %v608_v11  ;;  %v630_v11 = vld [vmem:[#allocation4 + $0x70] sm:$0xff] }
 0x228   :  { %1562 = vtanh.f32 %v2047_v5  ;;  %v613_v31 = vsel %vm612_vm2, %v1559_v51, %v609_v15 }
 0x229   :  { %v618_v43 = vsel %vm615_vm3, %v617_v40, %v613_v31 }
 0x22e   :  { %v1563_v30 = vpop.eup %1562 }
 0x22f   :  { %v624_v26 = vmul.f32 %v1563_v30, %v618_v43 }
 0x231   :  { %626 = vst [vmem:[#allocation9 + $0x10] sm:$0xff] %v624_v26  ;;  %v632_v23 = vpack.c.bf16 %v624_v26, %v624_v26 }
 0x233   :  { %641 = vmatmul.bf16.vlgmr.msrb.gmra.mxu0 %v632_v23  ;;  %654 = vmatmul.bf16.vlgmr.msrb.gmra.mxu1 %v632_v23 }
 0x234   :  { %667 = vmatmul.bf16.vlgmr.msrb.gmra.mxu2 %v632_v23  ;;  %680 = vmatmul.bf16.vlgmr.msrb.gmra.mxu3 %v632_v23 }
 0x235   :  { %887 = vmatpush.bf16.msrb.mxu0 %v1815_v3  ;;  %900 = vmatpush.bf16.msrb.mxu1 %v1817_v7 }
 0x236   :  { %913 = vmatpush.bf16.msrb.mxu2 %v1830_v21  ;;  %926 = vmatpush.bf16.msrb.mxu3 %v1819_v8 }
 0x239   :  { %888 = vmatpush.bf16.msrb.mxu0 %v1822_v12  ;;  %901 = vmatpush.bf16.msrb.mxu1 %v1826_v16 }
 0x23a   :  { %914 = vmatpush.bf16.msrb.mxu2 %v1842_v34  ;;  %927 = vmatpush.bf16.msrb.mxu3 %v1828_v17 }
 0x23d   :  { %889 = vmatpush.bf16.msrb.mxu0 %v1834_v28  ;;  %902 = vmatpush.bf16.msrb.mxu1 %v1838_v32 }
 0x23e   :  { %915 = vmatpush.bf16.msrb.mxu2 %v1848_v42  ;;  %928 = vmatpush.bf16.msrb.mxu3 %v1840_v33 }
 0x241   :  { %890 = vmatpush.bf16.msrb.mxu0 %v1846_v41  ;;  %903 = vmatpush.bf16.msrb.mxu1 %v1852_v45 }
 0x242   :  { %916 = vmatpush.bf16.msrb.mxu2 %v1860_v54  ;;  %929 = vmatpush.bf16.msrb.mxu3 %v1854_v46 }
 0x245   :  { %891 = vmatpush.bf16.msrb.mxu0 %v1858_v53  ;;  %904 = vmatpush.bf16.msrb.mxu1 %v1864_v57 }
 0x246   :  { %917 = vmatpush.bf16.msrb.mxu2 %v1872_v2  ;;  %930 = vmatpush.bf16.msrb.mxu3 %v1866_v58 }
 0x249   :  { %892 = vmatpush.bf16.msrb.mxu0 %v1870_v1  ;;  %905 = vmatpush.bf16.msrb.mxu1 %v1876_v6 }
 0x24a   :  { %918 = vmatpush.bf16.msrb.mxu2 %v1884_v20  ;;  %931 = vmatpush.bf16.msrb.mxu3 %v1878_v9 }
 0x24d   :  { %893 = vmatpush.bf16.msrb.mxu0 %v1882_v19  ;;  %906 = vmatpush.bf16.msrb.mxu1 %v1888_v24 }
 0x24e   :  { %919 = vmatpush.bf16.msrb.mxu2 %v1896_v37  ;;  %932 = vmatpush.bf16.msrb.mxu3 %v1890_v25 }
 0x251   :  { %894 = vmatpush.bf16.msrb.mxu0 %v1894_v36  ;;  %907 = vmatpush.bf16.msrb.mxu1 %v1900_v38 }
 0x252   :  { %920 = vmatpush.bf16.msrb.mxu2 %v1908_v44  ;;  %933 = vmatpush.bf16.msrb.mxu3 %v1902_v39 }
 0x2b0   :  { %v642_v14 = vpop.f32.mrf.mxu0  ;;  %v655_v47 = vpop.f32.mrf.mxu1 }
 0x2b1   :  { %v685_v48 = vadd.f32 %v642_v14, %v628_v10  ;;  %v686_v49 = vadd.f32 %v655_v47, %v629_v29 }
 0x2b3   :  { %v1457_v50 = vmul.f32 -1.442695, %v685_v48  ;;  %v1458_v51 = vmul.f32 -1.442695, %v686_v49 }
 0x2b5   :  { %1564 = vpow2.f32 %v1457_v50 }
 0x2b6   :  { %1566 = vpow2.f32 %v1458_v51 }
 0x2b7   :  { %v668_v55 = vpop.f32.mrf.mxu2  ;;  %v681_v56 = vpop.f32.mrf.mxu3 }
 0x2b8   :  { %v688_v59 = vadd.f32 %v681_v56, %v631_v52  ;;  %v644_v60 = vpop.f32.mrf.mxu0  ;;  %v657_v61 = vpop.f32.mrf.mxu1  ;;  %v687_v31 = vadd.f32 %v668_v55, %v630_v11 }
 0x2ba   :  { %v1459_v62 = vmul.f32 -1.442695, %v688_v59 }
 0x2bb   :  { %v1565_v63 = vpop.eup %1564 }
 0x2bc   :  { %v1567_v0 = vpop.eup %1566  ;;  %v692_v4 = vadd.f32 1.0, %v1565_v63  ;;  %1568 = vpow2.f32 %v1459_v62 }
 0x2bd   :  { %v711_v18 = vadd.f32 1.0, %v1567_v0 }
 0x2be   :  { %1570 = vrcp.f32 %v692_v4  ;;  %v704_v10 = vand.u32 2147483648, %v692_v4  ;;  %v702_v47 = vand.u32 2147483647, %v692_v4  ;;  %vm698_vm6 = vweird.f32 %v692_v4 }
 0x2bf   :  { %1572 = vrcp.f32 %v711_v18  ;;  %v670_v22 = vpop.f32.mrf.mxu2  ;;  %v683_v13 = vpop.f32.mrf.mxu3  ;;  %v723_v29 = vand.u32 2147483648, %v711_v18  ;;  %v721_v49 = vand.u32 2147483647, %v711_v18  ;;  %vm717_vm7 = vweird.f32 %v711_v18 }
 0x2c0   :  { %v705_v52 = vor.u32 1.1754944e-38, %v704_v10  ;;  %vm703_vm10 = vcmp.eq.f32.partialorder %v702_v47, 8.507059e+37 }
 0x2c1   :  { %v724_v59 = vor.u32 1.1754944e-38, %v723_v29  ;;  %vm722_vm11 = vcmp.eq.f32.partialorder %v721_v49, 8.507059e+37 }
 0x2c2   :  { %v1569_v15 = vpop.eup %1568 }
 0x2c3   :  { %v731_v35 = vadd.f32 1.0, %v1569_v15 }
 0x2c4   :  { %v1571_v27 = vpop.eup %1570 }
 0x2c5   :  { %v1573_v40 = vpop.eup %1572  ;;  %v694_v30 = vmul.f32 %v1571_v27, %v692_v4  ;;  %1574 = vrcp.f32 %v731_v35  ;;  %vm699_vm4 = vweird.f32 %v1571_v27  ;;  %vm737_vm13 = vweird.f32 %v731_v35 }
 0x2c6   :  { %v713_v43 = vmul.f32 %v1573_v40, %v711_v18  ;;  %1576 = vtanh.f32 %v687_v31  ;;  %vm718_vm5 = vweird.f32 %v1573_v40  ;;  %vm700_vm8 = vmor %vm698_vm6, %vm699_vm4  ;;  %v743_v31 = vand.u32 2147483648, %v731_v35 }
 0x2c7   :  { %v695_v26 = vsub.f32 1.0, %v694_v30  ;;  %vm719_vm9 = vmor %vm717_vm7, %vm718_vm5 }
 0x2c8   :  { %v714_v23 = vsub.f32 1.0, %v713_v43  ;;  %v744_v43 = vor.u32 1.1754944e-38, %v743_v31 }
 0x2c9   :  { %v696_v14 = vmul.f32 %v1571_v27, %v695_v26 }
 0x2ca   :  { %v715_v48 = vmul.f32 %v1573_v40, %v714_v23 }
 0x2cb   :  { %v1575_v50 = vpop.eup %1574  ;;  %v697_v51 = vadd.f32 %v1571_v27, %v696_v14 }
 0x2cc   :  { %v716_v55 = vadd.f32 %v1573_v40, %v715_v48  ;;  %v733_v56 = vmul.f32 %v1575_v50, %v731_v35  ;;  %v1577_v61 = vpop.eup %1576  ;;  %vm738_vm12 = vweird.f32 %v1575_v50 }
 0x2cd   :  { %v701_v60 = vsel %vm700_vm8, %v1571_v27, %v697_v51  ;;  %v741_v27 = vand.u32 2147483647, %v731_v35  ;;  %vm739_vm14 = vmor %vm737_vm13, %vm738_vm12  ;;  %v756_v35 = vld [vmem:[#allocation4 + $0x88] sm:$0xff]  ;;  %v758_v51 = vld [vmem:[#allocation4 + $0x98] sm:$0xff] }
 0x2ce   :  { %v706_v62 = vsel %vm703_vm10, %v705_v52, %v701_v60  ;;  %v720_v63 = vsel %vm719_vm9, %v1573_v40, %v716_v55  ;;  %v734_v0 = vsub.f32 1.0, %v733_v56 }
 0x2cf   :  { %v725_v22 = vsel %vm722_vm11, %v724_v59, %v720_v63  ;;  %v748_v13 = vmul.f32 %v1577_v61, %v706_v62  ;;  %vm742_vm15 = vcmp.eq.f32.partialorder %v741_v27, 8.507059e+37 }
 0x2d0   :  { %v747_v11 = vmul.f32 %v725_v22, %v2047_v5  ;;  %v735_v15 = vmul.f32 %v1575_v50, %v734_v0  ;;  %v755_v5 = vld [vmem:[#allocation4 + $0x80] sm:$0xff] }
 0x2d2   :  { %v2083_v4 = vadd.f32 %v748_v13, %v747_v11  ;;  %v736_v18 = vadd.f32 %v1575_v50, %v735_v15  ;;  %v757_v15 = vld [vmem:[#allocation4 + $0x90] sm:$0xff] }
 0x2d4   :  { %1578 = vtanh.f32 %v2083_v4  ;;  %v740_v30 = vsel %vm739_vm14, %v1575_v50, %v736_v18 }
 0x2d5   :  { %v745_v26 = vsel %vm742_vm15, %v744_v43, %v740_v30 }
 0x2da   :  { %v1579_v40 = vpop.eup %1578 }
 0x2db   :  { %v751_v23 = vmul.f32 %v1579_v40, %v745_v26 }
 0x2dd   :  { %753 = vst [vmem:[#allocation9 + $0x18] sm:$0xff] %v751_v23  ;;  %v759_v10 = vpack.c.bf16 %v751_v23, %v751_v23 }
 0x2df   :  { %768 = vmatmul.bf16.vlgmr.msra.gmra.mxu0 %v759_v10  ;;  %781 = vmatmul.bf16.vlgmr.msra.gmra.mxu1 %v759_v10 }
 0x2e0   :  { %794 = vmatmul.bf16.vlgmr.msra.gmra.mxu2 %v759_v10  ;;  %807 = vmatmul.bf16.vlgmr.msra.gmra.mxu3 %v759_v10 }
 0x2e1   :  { %1014 = vmatpush.bf16.msra.mxu0 %v1815_v3  ;;  %1027 = vmatpush.bf16.msra.mxu1 %v1817_v7 }
 0x2e2   :  { %1040 = vmatpush.bf16.msra.mxu2 %v1830_v21  ;;  %1053 = vmatpush.bf16.msra.mxu3 %v1819_v8 }
 0x2e5   :  { %1015 = vmatpush.bf16.msra.mxu0 %v1822_v12  ;;  %1028 = vmatpush.bf16.msra.mxu1 %v1826_v16 }
 0x2e6   :  { %1041 = vmatpush.bf16.msra.mxu2 %v1842_v34  ;;  %1054 = vmatpush.bf16.msra.mxu3 %v1828_v17 }
 0x2e9   :  { %1016 = vmatpush.bf16.msra.mxu0 %v1834_v28  ;;  %1029 = vmatpush.bf16.msra.mxu1 %v1838_v32 }
 0x2ea   :  { %1042 = vmatpush.bf16.msra.mxu2 %v1848_v42  ;;  %1055 = vmatpush.bf16.msra.mxu3 %v1840_v33 }
 0x2ed   :  { %1017 = vmatpush.bf16.msra.mxu0 %v1846_v41  ;;  %1030 = vmatpush.bf16.msra.mxu1 %v1852_v45 }
 0x2ee   :  { %1043 = vmatpush.bf16.msra.mxu2 %v1860_v54  ;;  %1056 = vmatpush.bf16.msra.mxu3 %v1854_v46 }
 0x2f1   :  { %1018 = vmatpush.bf16.msra.mxu0 %v1858_v53  ;;  %1031 = vmatpush.bf16.msra.mxu1 %v1864_v57 }
 0x2f2   :  { %1044 = vmatpush.bf16.msra.mxu2 %v1872_v2  ;;  %1057 = vmatpush.bf16.msra.mxu3 %v1866_v58 }
 0x2f5   :  { %1019 = vmatpush.bf16.msra.mxu0 %v1870_v1  ;;  %1032 = vmatpush.bf16.msra.mxu1 %v1876_v6 }
 0x2f6   :  { %1045 = vmatpush.bf16.msra.mxu2 %v1884_v20  ;;  %1058 = vmatpush.bf16.msra.mxu3 %v1878_v9 }
 0x2f9   :  { %1020 = vmatpush.bf16.msra.mxu0 %v1882_v19  ;;  %1033 = vmatpush.bf16.msra.mxu1 %v1888_v24 }
 0x2fa   :  { %1046 = vmatpush.bf16.msra.mxu2 %v1896_v37  ;;  %1059 = vmatpush.bf16.msra.mxu3 %v1890_v25 }
 0x2fd   :  { %1021 = vmatpush.bf16.msra.mxu0 %v1894_v36  ;;  %1034 = vmatpush.bf16.msra.mxu1 %v1900_v38 }
 0x2fe   :  { %1047 = vmatpush.bf16.msra.mxu2 %v1908_v44  ;;  %1060 = vmatpush.bf16.msra.mxu3 %v1902_v39 }
 0x35c   :  { %v769_v29 = vpop.f32.mrf.mxu0  ;;  %v782_v14 = vpop.f32.mrf.mxu1 }
 0x35d   :  { %v812_v47 = vadd.f32 %v769_v29, %v755_v5  ;;  %v813_v48 = vadd.f32 %v782_v14, %v756_v35 }
 0x35f   :  { %v1460_v49 = vmul.f32 -1.442695, %v812_v47  ;;  %v1461_v50 = vmul.f32 -1.442695, %v813_v48 }
 0x361   :  { %1580 = vpow2.f32 %v1460_v49 }
 0x362   :  { %1582 = vpow2.f32 %v1461_v50 }
 0x363   :  { %v795_v52 = vpop.f32.mrf.mxu2  ;;  %v808_v55 = vpop.f32.mrf.mxu3 }
 0x364   :  { %v815_v56 = vadd.f32 %v808_v55, %v758_v51  ;;  %v771_v59 = vpop.f32.mrf.mxu0  ;;  %v784_v60 = vpop.f32.mrf.mxu1  ;;  %v814_v30 = vadd.f32 %v795_v52, %v757_v15 }
 0x366   :  { %v1462_v61 = vmul.f32 -1.442695, %v815_v56 }
 0x367   :  { %v1581_v62 = vpop.eup %1580 }
 0x368   :  { %v1583_v63 = vpop.eup %1582  ;;  %v819_v0 = vadd.f32 1.0, %v1581_v62  ;;  %1584 = vpow2.f32 %v1462_v61 }
 0x369   :  { %v838_v22 = vadd.f32 1.0, %v1583_v63 }
 0x36a   :  { %1586 = vrcp.f32 %v819_v0  ;;  %v831_v5 = vand.u32 2147483648, %v819_v0  ;;  %v829_v14 = vand.u32 2147483647, %v819_v0  ;;  %vm825_vm2 = vweird.f32 %v819_v0 }
 0x36b   :  { %1588 = vrcp.f32 %v838_v22  ;;  %v797_v13 = vpop.f32.mrf.mxu2  ;;  %v810_v11 = vpop.f32.mrf.mxu3  ;;  %v850_v35 = vand.u32 2147483648, %v838_v22  ;;  %v848_v48 = vand.u32 2147483647, %v838_v22  ;;  %vm844_vm3 = vweird.f32 %v838_v22 }
 0x36c   :  { %v832_v51 = vor.u32 1.1754944e-38, %v831_v5  ;;  %vm830_vm6 = vcmp.eq.f32.partialorder %v829_v14, 8.507059e+37 }
 0x36d   :  { %v851_v56 = vor.u32 1.1754944e-38, %v850_v35  ;;  %vm849_vm7 = vcmp.eq.f32.partialorder %v848_v48, 8.507059e+37 }
 0x36e   :  { %v1585_v18 = vpop.eup %1584 }
 0x36f   :  { %v858_v31 = vadd.f32 1.0, %v1585_v18 }
 0x370   :  { %v1587_v27 = vpop.eup %1586 }
 0x371   :  { %v1589_v43 = vpop.eup %1588  ;;  %v821_v40 = vmul.f32 %v1587_v27, %v819_v0  ;;  %1590 = vrcp.f32 %v858_v31  ;;  %vm826_vm0 = vweird.f32 %v1587_v27  ;;  %vm864_vm9 = vweird.f32 %v858_v31 }
 0x372   :  { %v840_v26 = vmul.f32 %v1589_v43, %v838_v22  ;;  %1592 = vtanh.f32 %v814_v30  ;;  %vm845_vm1 = vweird.f32 %v1589_v43  ;;  %vm827_vm4 = vmor %vm825_vm2, %vm826_vm0  ;;  %v870_v30 = vand.u32 2147483648, %v858_v31 }
 0x373   :  { %v822_v23 = vsub.f32 1.0, %v821_v40  ;;  %vm846_vm5 = vmor %vm844_vm3, %vm845_vm1 }
 0x374   :  { %v841_v10 = vsub.f32 1.0, %v840_v26  ;;  %v871_v26 = vor.u32 1.1754944e-38, %v870_v30 }
 0x375   :  { %v823_v29 = vmul.f32 %v1587_v27, %v822_v23 }
 0x376   :  { %v842_v47 = vmul.f32 %v1589_v43, %v841_v10 }
 0x377   :  { %v1591_v49 = vpop.eup %1590  ;;  %v824_v50 = vadd.f32 %v1587_v27, %v823_v29 }
 0x378   :  { %v843_v52 = vadd.f32 %v1589_v43, %v842_v47  ;;  %v860_v55 = vmul.f32 %v1591_v49, %v858_v31  ;;  %v1593_v60 = vpop.eup %1592  ;;  %vm865_vm8 = vweird.f32 %v1591_v49 }
 0x379   :  { %v828_v59 = vsel %vm827_vm4, %v1587_v27, %v824_v50  ;;  %v868_v27 = vand.u32 2147483647, %v858_v31  ;;  %vm866_vm10 = vmor %vm864_vm9, %vm865_vm8 }
 0x37a   :  { %v833_v61 = vsel %vm830_vm6, %v832_v51, %v828_v59  ;;  %v847_v62 = vsel %vm846_vm5, %v1589_v43, %v843_v52  ;;  %v861_v63 = vsub.f32 1.0, %v860_v55 }
 0x37b   :  { %v852_v13 = vsel %vm849_vm7, %v851_v56, %v847_v62  ;;  %v875_v11 = vmul.f32 %v1593_v60, %v833_v61  ;;  %vm869_vm11 = vcmp.eq.f32.partialorder %v868_v27, 8.507059e+37 }
 0x37c   :  { %v874_v15 = vmul.f32 %v852_v13, %v2083_v4  ;;  %v862_v18 = vmul.f32 %v1591_v49, %v861_v63 }
 0x37e   :  { %v2119_v0 = vadd.f32 %v875_v11, %v874_v15  ;;  %v863_v22 = vadd.f32 %v1591_v49, %v862_v18 }
 0x380   :  { %1594 = vtanh.f32 %v2119_v0  ;;  %v867_v40 = vsel %vm866_vm10, %v1591_v49, %v863_v22 }
 0x381   :  { %v872_v23 = vsel %vm869_vm11, %v871_v26, %v867_v40 }
 0x386   :  { %v1595_v43 = vpop.eup %1594 }
 0x387   :  { %v878_v10 = vmul.f32 %v1595_v43, %v872_v23 }
 0x389   :  { %880 = vst [vmem:[#allocation9 + $0x20] sm:$0xff] %v878_v10  ;;  %v886_v5 = vpack.c.bf16 %v878_v10, %v878_v10 }
 0x38b   :  { %895 = vmatmul.bf16.vlgmr.msrb.gmra.mxu0 %v886_v5  ;;  %908 = vmatmul.bf16.vlgmr.msrb.gmra.mxu1 %v886_v5 }
 0x38c   :  { %921 = vmatmul.bf16.vlgmr.msrb.gmra.mxu2 %v886_v5  ;;  %934 = vmatmul.bf16.vlgmr.msrb.gmra.mxu3 %v886_v5  ;;  %v1010_v5 = vld [vmem:[#allocation4 + $0xc8] sm:$0xff] }
 0x38d   :  { %1141 = vmatpush.bf16.msrb.mxu0 %v1815_v3  ;;  %1154 = vmatpush.bf16.msrb.mxu1 %v1817_v7  ;;  %v882_v3 = vld [vmem:[#allocation4 + $0xa0] sm:$0xff]  ;;  %v883_v7 = vld [vmem:[#allocation4 + $0xa8] sm:$0xff] }
 0x38e   :  { %1167 = vmatpush.bf16.msrb.mxu2 %v1830_v21  ;;  %1180 = vmatpush.bf16.msrb.mxu3 %v1819_v8 }
 0x391   :  { %1142 = vmatpush.bf16.msrb.mxu0 %v1822_v12  ;;  %1155 = vmatpush.bf16.msrb.mxu1 %v1826_v16 }
 0x392   :  { %1168 = vmatpush.bf16.msrb.mxu2 %v1842_v34  ;;  %1181 = vmatpush.bf16.msrb.mxu3 %v1828_v17 }
 0x395   :  { %1143 = vmatpush.bf16.msrb.mxu0 %v1834_v28  ;;  %1156 = vmatpush.bf16.msrb.mxu1 %v1838_v32  ;;  %v885_v32 = vld [vmem:[#allocation4 + $0xb8] sm:$0xff] }
 0x396   :  { %1169 = vmatpush.bf16.msrb.mxu2 %v1848_v42  ;;  %1182 = vmatpush.bf16.msrb.mxu3 %v1840_v33 }
 0x399   :  { %1144 = vmatpush.bf16.msrb.mxu0 %v1846_v41  ;;  %1157 = vmatpush.bf16.msrb.mxu1 %v1852_v45 }
 0x39a   :  { %1170 = vmatpush.bf16.msrb.mxu2 %v1860_v54  ;;  %1183 = vmatpush.bf16.msrb.mxu3 %v1854_v46 }
 0x39d   :  { %1145 = vmatpush.bf16.msrb.mxu0 %v1858_v53  ;;  %1158 = vmatpush.bf16.msrb.mxu1 %v1864_v57 }
 0x39e   :  { %1171 = vmatpush.bf16.msrb.mxu2 %v1872_v2  ;;  %1184 = vmatpush.bf16.msrb.mxu3 %v1866_v58 }
 0x3a1   :  { %1146 = vmatpush.bf16.msrb.mxu0 %v1870_v1  ;;  %1159 = vmatpush.bf16.msrb.mxu1 %v1876_v6  ;;  %v884_v6 = vld [vmem:[#allocation4 + $0xb0] sm:$0xff] }
 0x3a2   :  { %1172 = vmatpush.bf16.msrb.mxu2 %v1884_v20  ;;  %1185 = vmatpush.bf16.msrb.mxu3 %v1878_v9 }
 0x3a5   :  { %1147 = vmatpush.bf16.msrb.mxu0 %v1882_v19  ;;  %1160 = vmatpush.bf16.msrb.mxu1 %v1888_v24 }
 0x3a6   :  { %1173 = vmatpush.bf16.msrb.mxu2 %v1896_v37  ;;  %1186 = vmatpush.bf16.msrb.mxu3 %v1890_v25 }
 0x3a9   :  { %1148 = vmatpush.bf16.msrb.mxu0 %v1894_v36  ;;  %1161 = vmatpush.bf16.msrb.mxu1 %v1900_v38 }
 0x3aa   :  { %1174 = vmatpush.bf16.msrb.mxu2 %v1908_v44  ;;  %1187 = vmatpush.bf16.msrb.mxu3 %v1902_v39 }
 0x408   :  { %v896_v8 = vpop.f32.mrf.mxu0  ;;  %v909_v12 = vpop.f32.mrf.mxu1 }
 0x409   :  { %v939_v16 = vadd.f32 %v896_v8, %v882_v3  ;;  %v940_v17 = vadd.f32 %v909_v12, %v883_v7 }
 0x40b   :  { %v1463_v21 = vmul.f32 -1.442695, %v939_v16  ;;  %v1464_v28 = vmul.f32 -1.442695, %v940_v17 }
 0x40d   :  { %1596 = vpow2.f32 %v1463_v21  ;;  %v1012_v21 = vld [vmem:[#allocation4 + $0xd8] sm:$0xff] }
 0x40e   :  { %1598 = vpow2.f32 %v1464_v28 }
 0x40f   :  { %v922_v33 = vpop.f32.mrf.mxu2  ;;  %v935_v34 = vpop.f32.mrf.mxu3 }
 0x410   :  { %v942_v41 = vadd.f32 %v935_v34, %v885_v32  ;;  %v898_v42 = vpop.f32.mrf.mxu0  ;;  %v911_v45 = vpop.f32.mrf.mxu1  ;;  %v941_v24 = vadd.f32 %v922_v33, %v884_v6 }
 0x412   :  { %v1465_v46 = vmul.f32 -1.442695, %v942_v41 }
 0x413   :  { %v1597_v53 = vpop.eup %1596 }
 0x414   :  { %v1599_v54 = vpop.eup %1598  ;;  %v946_v57 = vadd.f32 1.0, %v1597_v53  ;;  %1600 = vpow2.f32 %v1465_v46 }
 0x415   :  { %v965_v58 = vadd.f32 1.0, %v1599_v54 }
 0x416   :  { %1602 = vrcp.f32 %v946_v57  ;;  %v958_v44 = vand.u32 2147483648, %v946_v57  ;;  %v956_v35 = vand.u32 2147483647, %v946_v57  ;;  %vm952_vm14 = vweird.f32 %v946_v57 }
 0x417   :  { %1604 = vrcp.f32 %v965_v58  ;;  %v924_v1 = vpop.f32.mrf.mxu2  ;;  %v937_v2 = vpop.f32.mrf.mxu3  ;;  %v977_v4 = vand.u32 2147483648, %v965_v58  ;;  %v975_v14 = vand.u32 2147483647, %v965_v58  ;;  %vm971_vm15 = vweird.f32 %v965_v58 }
 0x418   :  { %v959_v49 = vor.u32 1.1754944e-38, %v958_v44  ;;  %vm957_vm2 = vcmp.eq.f32.partialorder %v956_v35, 8.507059e+37  ;;  %v1011_v1 = vld [vmem:[#allocation4 + $0xd0] sm:$0xff] }
 0x419   :  { %v978_v52 = vor.u32 1.1754944e-38, %v977_v4  ;;  %vm976_vm3 = vcmp.eq.f32.partialorder %v975_v14, 8.507059e+37 }
 0x41a   :  { %v1601_v9 = vpop.eup %1600 }
 0x41b   :  { %v985_v19 = vadd.f32 1.0, %v1601_v9 }
 0x41c   :  { %v1603_v20 = vpop.eup %1602 }
 0x41d   :  { %v1605_v25 = vpop.eup %1604  ;;  %v948_v36 = vmul.f32 %v1603_v20, %v946_v57  ;;  %1606 = vrcp.f32 %v985_v19  ;;  %vm953_vm12 = vweird.f32 %v1603_v20  ;;  %v997_v22 = vand.u32 2147483648, %v985_v19 }
 0x41e   :  { %v967_v37 = vmul.f32 %v1605_v25, %v965_v58  ;;  %1608 = vtanh.f32 %v941_v24  ;;  %vm972_vm13 = vweird.f32 %v1605_v25  ;;  %vm954_vm0 = vmor %vm952_vm14, %vm953_vm12  ;;  %vm991_vm5 = vweird.f32 %v985_v19 }
 0x41f   :  { %v949_v38 = vsub.f32 1.0, %v948_v36  ;;  %vm973_vm1 = vmor %vm971_vm15, %vm972_vm13  ;;  %v995_v30 = vand.u32 2147483647, %v985_v19  ;;  %v998_v40 = vor.u32 1.1754944e-38, %v997_v22 }
 0x420   :  { %v968_v39 = vsub.f32 1.0, %v967_v37 }
 0x421   :  { %v950_v31 = vmul.f32 %v1603_v20, %v949_v38  ;;  %vm996_vm7 = vcmp.eq.f32.partialorder %v995_v30, 8.507059e+37 }
 0x422   :  { %v969_v29 = vmul.f32 %v1605_v25, %v968_v39 }
 0x423   :  { %v1607_v47 = vpop.eup %1606  ;;  %v951_v48 = vadd.f32 %v1603_v20, %v950_v31 }
 0x424   :  { %v970_v50 = vadd.f32 %v1605_v25, %v969_v29  ;;  %v987_v51 = vmul.f32 %v1607_v47, %v985_v19  ;;  %v1609_v56 = vpop.eup %1608  ;;  %vm992_vm4 = vweird.f32 %v1607_v47 }
 0x425   :  { %v955_v55 = vsel %vm954_vm0, %v1603_v20, %v951_v48  ;;  %vm993_vm6 = vmor %vm991_vm5, %vm992_vm4 }
 0x426   :  { %v960_v59 = vsel %vm957_vm2, %v959_v49, %v955_v55  ;;  %v974_v60 = vsel %vm973_vm1, %v1605_v25, %v970_v50  ;;  %v988_v61 = vsub.f32 1.0, %v987_v51 }
 0x427   :  { %v979_v62 = vsel %vm976_vm3, %v978_v52, %v974_v60  ;;  %v1002_v63 = vmul.f32 %v1609_v56, %v960_v59 }
 0x428   :  { %v1001_v13 = vmul.f32 %v979_v62, %v2119_v0  ;;  %v989_v11 = vmul.f32 %v1607_v47, %v988_v61  ;;  %v1009_v0 = vld [vmem:[#allocation4 + $0xc0] sm:$0xff] }
 0x42a   :  { %v2155_v15 = vadd.f32 %v1002_v63, %v1001_v13  ;;  %v990_v18 = vadd.f32 %v1607_v47, %v989_v11 }
 0x42c   :  { %1610 = vtanh.f32 %v2155_v15  ;;  %v994_v27 = vsel %vm993_vm6, %v1607_v47, %v990_v18 }
 0x42d   :  { %v999_v43 = vsel %vm996_vm7, %v998_v40, %v994_v27 }
 0x432   :  { %v1611_v26 = vpop.eup %1610 }
 0x433   :  { %v1005_v23 = vmul.f32 %v1611_v26, %v999_v43 }
 0x435   :  { %1007 = vst [vmem:[#allocation9 + $0x28] sm:$0xff] %v1005_v23  ;;  %v1013_v10 = vpack.c.bf16 %v1005_v23, %v1005_v23 }
 0x437   :  { %1022 = vmatmul.bf16.vlgmr.msra.gmra.mxu0 %v1013_v10  ;;  %1035 = vmatmul.bf16.vlgmr.msra.gmra.mxu1 %v1013_v10 }
 0x438   :  { %1048 = vmatmul.bf16.vlgmr.msra.gmra.mxu2 %v1013_v10  ;;  %1061 = vmatmul.bf16.vlgmr.msra.gmra.mxu3 %v1013_v10  ;;  %v1137_v10 = vld [vmem:[#allocation4 + $0xe8] sm:$0xff] }
 0x4b4   :  { %v1023_v3 = vpop.f32.mrf.mxu0  ;;  %v1036_v7 = vpop.f32.mrf.mxu1 }
 0x4b5   :  { %v1066_v8 = vadd.f32 %v1023_v3, %v1009_v0  ;;  %v1067_v12 = vadd.f32 %v1036_v7, %v1010_v5 }
 0x4b7   :  { %v1466_v16 = vmul.f32 -1.442695, %v1066_v8  ;;  %v1467_v17 = vmul.f32 -1.442695, %v1067_v12 }
 0x4b9   :  { %1612 = vpow2.f32 %v1466_v16  ;;  %v1139_v16 = vld [vmem:[#allocation4 + $0xf8] sm:$0xff] }
 0x4ba   :  { %1614 = vpow2.f32 %v1467_v17 }
 0x4bb   :  { %v1049_v28 = vpop.f32.mrf.mxu2  ;;  %v1062_v32 = vpop.f32.mrf.mxu3 }
 0x4bc   :  { %v1069_v33 = vadd.f32 %v1062_v32, %v1012_v21  ;;  %v1025_v34 = vpop.f32.mrf.mxu0  ;;  %v1038_v41 = vpop.f32.mrf.mxu1  ;;  %v1068_v19 = vadd.f32 %v1049_v28, %v1011_v1 }
 0x4be   :  { %v1468_v42 = vmul.f32 -1.442695, %v1069_v33 }
 0x4bf   :  { %v1613_v45 = vpop.eup %1612 }
 0x4c0   :  { %v1615_v46 = vpop.eup %1614  ;;  %v1073_v53 = vadd.f32 1.0, %v1613_v45  ;;  %1616 = vpow2.f32 %v1468_v42 }
 0x4c1   :  { %v1092_v54 = vadd.f32 1.0, %v1615_v46 }
 0x4c2   :  { %1618 = vrcp.f32 %v1073_v53  ;;  %v1085_v38 = vand.u32 2147483648, %v1073_v53  ;;  %v1083_v4 = vand.u32 2147483647, %v1073_v53  ;;  %vm1079_vm10 = vweird.f32 %v1073_v53 }
 0x4c3   :  { %1620 = vrcp.f32 %v1092_v54  ;;  %v1051_v57 = vpop.f32.mrf.mxu2  ;;  %v1064_v58 = vpop.f32.mrf.mxu3  ;;  %v1104_v39 = vand.u32 2147483648, %v1092_v54  ;;  %v1102_v35 = vand.u32 2147483647, %v1092_v54  ;;  %vm1098_vm11 = vweird.f32 %v1092_v54 }
 0x4c4   :  { %v1086_v47 = vor.u32 1.1754944e-38, %v1085_v38  ;;  %vm1084_vm14 = vcmp.eq.f32.partialorder %v1083_v4, 8.507059e+37  ;;  %v1138_v57 = vld [vmem:[#allocation4 + $0xf0] sm:$0xff] }
 0x4c5   :  { %v1105_v50 = vor.u32 1.1754944e-38, %v1104_v39  ;;  %vm1103_vm15 = vcmp.eq.f32.partialorder %v1102_v35, 8.507059e+37 }
 0x4c6   :  { %v1617_v2 = vpop.eup %1616 }
 0x4c7   :  { %v1112_v6 = vadd.f32 1.0, %v1617_v2 }
 0x4c8   :  { %v1619_v9 = vpop.eup %1618 }
 0x4c9   :  { %v1621_v20 = vpop.eup %1620  ;;  %v1075_v24 = vmul.f32 %v1619_v9, %v1073_v53  ;;  %1622 = vrcp.f32 %v1112_v6  ;;  %vm1080_vm8 = vweird.f32 %v1619_v9  ;;  %v1124_v18 = vand.u32 2147483648, %v1112_v6 }
 0x4ca   :  { %v1094_v25 = vmul.f32 %v1621_v20, %v1092_v54  ;;  %1624 = vtanh.f32 %v1068_v19  ;;  %vm1099_vm9 = vweird.f32 %v1621_v20  ;;  %vm1081_vm12 = vmor %vm1079_vm10, %vm1080_vm8  ;;  %vm1118_vm1 = vweird.f32 %v1112_v6 }
 0x4cb   :  { %v1076_v36 = vsub.f32 1.0, %v1075_v24  ;;  %vm1100_vm13 = vmor %vm1098_vm11, %vm1099_vm9  ;;  %v1122_v22 = vand.u32 2147483647, %v1112_v6  ;;  %v1125_v27 = vor.u32 1.1754944e-38, %v1124_v18 }
 0x4cc   :  { %v1095_v37 = vsub.f32 1.0, %v1094_v25 }
 0x4cd   :  { %v1077_v44 = vmul.f32 %v1619_v9, %v1076_v36  ;;  %vm1123_vm3 = vcmp.eq.f32.partialorder %v1122_v22, 8.507059e+37 }
 0x4ce   :  { %v1096_v31 = vmul.f32 %v1621_v20, %v1095_v37 }
 0x4cf   :  { %v1623_v29 = vpop.eup %1622  ;;  %v1078_v14 = vadd.f32 %v1619_v9, %v1077_v44 }
 0x4d0   :  { %v1097_v48 = vadd.f32 %v1621_v20, %v1096_v31  ;;  %v1114_v49 = vmul.f32 %v1623_v29, %v1112_v6  ;;  %v1625_v52 = vpop.eup %1624  ;;  %vm1119_vm0 = vweird.f32 %v1623_v29 }
 0x4d1   :  { %v1082_v51 = vsel %vm1081_vm12, %v1619_v9, %v1078_v14  ;;  %vm1120_vm2 = vmor %vm1118_vm1, %vm1119_vm0 }
 0x4d2   :  { %v1087_v55 = vsel %vm1084_vm14, %v1086_v47, %v1082_v51  ;;  %v1101_v56 = vsel %vm1100_vm13, %v1621_v20, %v1097_v48  ;;  %v1115_v59 = vsub.f32 1.0, %v1114_v49 }
 0x4d3   :  { %v1106_v60 = vsel %vm1103_vm15, %v1105_v50, %v1101_v56  ;;  %v1129_v61 = vmul.f32 %v1625_v52, %v1087_v55 }
 0x4d4   :  { %v1128_v62 = vmul.f32 %v1106_v60, %v2155_v15  ;;  %v1116_v63 = vmul.f32 %v1623_v29, %v1115_v59  ;;  %v1136_v15 = vld [vmem:[#allocation4 + $0xe0] sm:$0xff] }
 0x4d6   :  { %v2159_v13 = vadd.f32 %v1129_v61, %v1128_v62  ;;  %v1117_v11 = vadd.f32 %v1623_v29, %v1116_v63 }
 0x4d8   :  { %1626 = vtanh.f32 %v2159_v13  ;;  %v1121_v30 = vsel %vm1120_vm2, %v1623_v29, %v1117_v11 }
 0x4d9   :  { %v1126_v26 = vsel %vm1123_vm3, %v1125_v27, %v1121_v30 }
 0x4de   :  { %v1627_v40 = vpop.eup %1626 }
 0x4df   :  { %v1132_v43 = vmul.f32 %v1627_v40, %v1126_v26 }
 0x4e1   :  { %1134 = vst [vmem:[#allocation9 + $0x30] sm:$0xff] %v1132_v43  ;;  %v1140_v23 = vpack.c.bf16 %v1132_v43, %v1132_v43 }
 0x4e3   :  { %1149 = vmatmul.bf16.vlgmr.msrb.gmra.mxu0 %v1140_v23  ;;  %1162 = vmatmul.bf16.vlgmr.msrb.gmra.mxu1 %v1140_v23 }
 0x4e4   :  { %1175 = vmatmul.bf16.vlgmr.msrb.gmra.mxu2 %v1140_v23  ;;  %1188 = vmatmul.bf16.vlgmr.msrb.gmra.mxu3 %v1140_v23 }
 0x560   :  { %v1150_v0 = vpop.f32.mrf.mxu0  ;;  %v1163_v5 = vpop.f32.mrf.mxu1 }
 0x561   :  { %v1193_v3 = vadd.f32 %v1150_v0, %v1136_v15  ;;  %v1194_v7 = vadd.f32 %v1163_v5, %v1137_v10 }
 0x563   :  { %v1469_v8 = vmul.f32 -1.442695, %v1193_v3  ;;  %v1470_v12 = vmul.f32 -1.442695, %v1194_v7 }
 0x565   :  { %1628 = vpow2.f32 %v1469_v8 }
 0x566   :  { %1630 = vpow2.f32 %v1470_v12 }
 0x567   :  { %v1176_v17 = vpop.f32.mrf.mxu2  ;;  %v1189_v21 = vpop.f32.mrf.mxu3 }
 0x568   :  { %v1196_v28 = vadd.f32 %v1189_v21, %v1139_v16  ;;  %v1152_v32 = vpop.f32.mrf.mxu0  ;;  %v1165_v33 = vpop.f32.mrf.mxu1  ;;  %v1195_v6 = vadd.f32 %v1176_v17, %v1138_v57 }
 0x56a   :  { %v1471_v34 = vmul.f32 -1.442695, %v1196_v28 }
 0x56b   :  { %v1629_v41 = vpop.eup %1628 }
 0x56c   :  { %v1631_v42 = vpop.eup %1630  ;;  %v1200_v45 = vadd.f32 1.0, %v1629_v41  ;;  %1632 = vpow2.f32 %v1471_v34 }
 0x56d   :  { %v1219_v46 = vadd.f32 1.0, %v1631_v42 }
 0x56e   :  { %1634 = vrcp.f32 %v1200_v45  ;;  %v1212_v36 = vand.u32 2147483648, %v1200_v45  ;;  %v1210_v39 = vand.u32 2147483647, %v1200_v45  ;;  %vm1206_vm6 = vweird.f32 %v1200_v45 }
 0x56f   :  { %1636 = vrcp.f32 %v1219_v46  ;;  %v1178_v53 = vpop.f32.mrf.mxu2  ;;  %v1191_v54 = vpop.f32.mrf.mxu3  ;;  %v1231_v37 = vand.u32 2147483648, %v1219_v46  ;;  %v1229_v4 = vand.u32 2147483647, %v1219_v46  ;;  %vm1225_vm7 = vweird.f32 %v1219_v46 }
 0x570   :  { %v1213_v29 = vor.u32 1.1754944e-38, %v1212_v36  ;;  %vm1211_vm10 = vcmp.eq.f32.partialorder %v1210_v39, 8.507059e+37 }
 0x571   :  { %v1232_v48 = vor.u32 1.1754944e-38, %v1231_v37  ;;  %vm1230_vm11 = vcmp.eq.f32.partialorder %v1229_v4, 8.507059e+37 }
 0x572   :  { %v1633_v58 = vpop.eup %1632 }
 0x573   :  { %v1239_v1 = vadd.f32 1.0, %v1633_v58 }
 0x574   :  { %v1635_v2 = vpop.eup %1634 }
 0x575   :  { %v1637_v9 = vpop.eup %1636  ;;  %v1202_v19 = vmul.f32 %v1635_v2, %v1200_v45  ;;  %1638 = vrcp.f32 %v1239_v1  ;;  %vm1207_vm4 = vweird.f32 %v1635_v2  ;;  %v1251_v11 = vand.u32 2147483648, %v1239_v1 }
 0x576   :  { %v1221_v20 = vmul.f32 %v1637_v9, %v1219_v46  ;;  %1640 = vtanh.f32 %v1195_v6  ;;  %vm1226_vm5 = vweird.f32 %v1637_v9  ;;  %vm1208_vm8 = vmor %vm1206_vm6, %vm1207_vm4  ;;  %vm1245_vm13 = vweird.f32 %v1239_v1 }
 0x577   :  { %v1203_v24 = vsub.f32 1.0, %v1202_v19  ;;  %vm1227_vm9 = vmor %vm1225_vm7, %vm1226_vm5  ;;  %v1249_v18 = vand.u32 2147483647, %v1239_v1  ;;  %v1252_v30 = vor.u32 1.1754944e-38, %v1251_v11 }
 0x578   :  { %v1222_v25 = vsub.f32 1.0, %v1221_v20 }
 0x579   :  { %v1204_v38 = vmul.f32 %v1635_v2, %v1203_v24  ;;  %vm1250_vm15 = vcmp.eq.f32.partialorder %v1249_v18, 8.507059e+37 }
 0x57a   :  { %v1223_v44 = vmul.f32 %v1637_v9, %v1222_v25 }
 0x57b   :  { %v1639_v31 = vpop.eup %1638  ;;  %v1205_v35 = vadd.f32 %v1635_v2, %v1204_v38 }
 0x57c   :  { %v1224_v14 = vadd.f32 %v1637_v9, %v1223_v44  ;;  %v1241_v47 = vmul.f32 %v1639_v31, %v1239_v1  ;;  %v1641_v50 = vpop.eup %1640  ;;  %vm1246_vm12 = vweird.f32 %v1639_v31 }
 0x57d   :  { %v1209_v49 = vsel %vm1208_vm8, %v1635_v2, %v1205_v35  ;;  %vm1247_vm14 = vmor %vm1245_vm13, %vm1246_vm12 }
 0x57e   :  { %v1214_v51 = vsel %vm1211_vm10, %v1213_v29, %v1209_v49  ;;  %v1228_v52 = vsel %vm1227_vm9, %v1637_v9, %v1224_v14  ;;  %v1242_v55 = vsub.f32 1.0, %v1241_v47 }
 0x57f   :  { %v1233_v56 = vsel %vm1230_vm11, %v1232_v48, %v1228_v52  ;;  %v1256_v59 = vmul.f32 %v1641_v50, %v1214_v51 }
 0x580   :  { %v1255_v60 = vmul.f32 %v1233_v56, %v2159_v13  ;;  %v1243_v61 = vmul.f32 %v1639_v31, %v1242_v55 }
 0x582   :  { %v1257_v62 = vadd.f32 %v1256_v59, %v1255_v60  ;;  %v1244_v63 = vadd.f32 %v1639_v31, %v1243_v61 }
 0x584   :  { %1642 = vtanh.f32 %v1257_v62  ;;  %1268 = vst [vmem:[#allocation12] sm:$0xff] %v1257_v62  ;;  %v1248_v22 = vsel %vm1247_vm14, %v1639_v31, %v1244_v63 }
 0x585   :  { %v1253_v27 = vsel %vm1250_vm15, %v1252_v30, %v1248_v22 }
 0x58a   :  { %v1643_v13 = vpop.eup %1642 }
 0x58b   :  { %v1259_v40 = vmul.f32 %v1643_v13, %v1253_v27 }
 0x58d   :  { %1261 = vst [vmem:[#allocation9 + $0x38] sm:$0xff] %v1259_v40 }
 0x58e   :  { %1267 = vst [vmem:[#allocation10] sm:$0xff] %v1259_v40  ;;  %1281 = dma.vmem_to_hbm [thread:$0]  %s1274_s1, 1024, %s1276_s5, [#allocation6], %s1782_s2, %s1782_s2, %s1783_s3  }
 0x58f   :  { %1292 = dma.vmem_to_hbm [thread:$0]  %s1288_s7, 128, %s1290_s10, [#allocation11]  }
 0x590   :  { %1303 = dma.vmem_to_hbm [thread:$0]  %s1299_s12, 128, %s1301_s15, [#allocation11]  }
 0x591   :  { %1768 = dma.done.wait [#allocation6], 1024  }
 0x592   :  { %1769 = vsyncadd [#allocation6], 4294966272 }
 0x593   :  { %1770 = dma.done.wait [#allocation11], 256  }
 0x594   :  { %1771 = vsyncadd [#allocation11], 4294967040 }
 0x595   :  { %1316 = vsyncpa [#allocation5], 1 }
 0x596   :  { %1317 = vsyncpa [#allocation8], 1 }
 0x597   :  { %1318 = vsyncpa [#allocation6], 1 }
 0x598   :  { %1319 = vsyncpa [#allocation11], 1 }

</bundles_post_ra>
